<compile_context>
chip_gen: v5e
topology: v5e:2x2
jax: 0.10.0
libtpu: 0.0.40
codegen_flags: <defaults>
</compile_context>

<pallas_src>
import math

import jax
import jax.numpy as jnp
from jax.experimental import pallas as pl
from jax.experimental.pallas import tpu as pltpu


# ----------------------------------------------------------------------------
# Fused kernel (per grid step: one N tile, one batch element).
# ----------------------------------------------------------------------------
def _fused_cat_kernel(
    coords_ref,   # (Cd, TN)      shared coordinate grid tile (transposed)
    freq_ref,     # (nf, Cd)      frequency matrix pre-scaled by 2*pi
    feats_ref,    # (1, C, TN)    this batch element's features, channel-major
    zbias_ref,    # (1, 2H, 1)    [z@W1z_prior + b1_prior ; z@W1z_post + b1_post]
    w1c_ref,      # (2H, nf)      stacked cos rows of prior/post W1
    w1s_ref,      # (2H, nf)      stacked sin rows of prior/post W1
    w1f_ref,      # (2H, C)       feature rows (zeros in the prior half)
    w2_ref,       # (2K, 2H)      block-diagonal [W2_prior 0; 0 W2_post]
    b2_ref,       # (2K, 1)
    enc_ref,      # (1, 2nf, TN)  encoded coords, written only when b == 0
    pi_ref,       # (1, 2K, TN)   [pi_prior ; pi_post]
    cs_ref,       # scratch (2nf, TN): cos/sin cache, reused across the B axis
):
    nf = freq_ref.shape[0]
    b = pl.program_id(1)

    # ---- Fourier encoding: compute + store once per N tile (batch-invariant) --
    @pl.when(b == 0)
    def _():
        freq = freq_ref[...]                      # (nf, Cd)
        coords = coords_ref[...]                  # (Cd, TN)
        cd = freq.shape[1]
        # depth-Cd (=2) projection as VPU broadcast-FMAs (too shallow for MXU)
        proj = freq[:, 0:1] * coords[0:1, :]
        for d in range(1, cd):
            proj = proj + freq[:, d:d + 1] * coords[d:d + 1, :]
        cs_ref[0:nf, :] = jnp.cos(proj)
        cs_ref[nf:2 * nf, :] = jnp.sin(proj)
        enc_ref[0] = cs_ref[...]                  # single lane-dense store

    cosp = cs_ref[0:nf, :]                        # (nf, TN) cached
    sinp = cs_ref[nf:2 * nf, :]                   # (nf, TN) cached
    feat = feats_ref[0]                           # (C,  TN)

    # ---- first layer: h_all^T (2H, TN), prior and post fused ------------------
    h = jnp.dot(w1c_ref[...], cosp, preferred_element_type=jnp.float32)
    h = h + jnp.dot(w1s_ref[...], sinp, preferred_element_type=jnp.float32)
    w1f = w1f_ref[...]                            # (2H, C), prior half is zero
    for c in range(w1f.shape[1]):                 # depth-C (=3) -> VPU FMAs
        h = h + w1f[:, c:c + 1] * feat[c:c + 1, :]
    h = jnp.maximum(h + zbias_ref[0], 0.0)        # z term + b1 pre-folded

    # ---- second layer (block-diagonal) + per-half softmax ---------------------
    logits = jnp.dot(w2_ref[...], h, preferred_element_type=jnp.float32) + b2_ref[...]
    k = b2_ref.shape[0] // 2

    def softmax_rows(blk):                        # (K, TN), K static & tiny
        m = blk[0:1, :]
        for j in range(1, k):                     # unrolled pairwise max: no XLU
            m = jnp.maximum(m, blk[j:j + 1, :])
        e = jnp.exp(blk - m)
        s = e[0:1, :]
        for j in range(1, k):
            s = s + e[j:j + 1, :]
        return e / s                              # exact normalization (K=4)

    pi_prior = softmax_rows(logits[0:k, :])
    pi_post = softmax_rows(logits[k:2 * k, :])
    pi_ref[0] = jnp.concatenate([pi_prior, pi_post], axis=0)   # one 8-sublane store


def _pick_tile_n(n, cap=2048):
    """Largest multiple of 128 <= cap that divides n; fall back to full N."""
    tn = (min(cap, n) // 128) * 128
    while tn >= 128:
        if n % tn == 0:
            return tn
        tn -= 128
    return n


def fused_categorical_call(coords_t, freq2pi, feats_cm, zbias_all,
                           w1c_all, w1s_all, w1f_all, w2_all, b2_all):
    """coords_t:[Cd,N] freq2pi:[nf,Cd] feats_cm:[B,C,N] zbias_all:[B,2H,1]
    -> (enc_t [1,2F,N], pi_all [B,2K,N])."""
    cd, n = coords_t.shape
    nf = freq2pi.shape[0]
    bsz, c, _ = feats_cm.shape
    h2 = w1c_all.shape[0]
    k2 = w2_all.shape[0]
    tn = _pick_tile_n(n)
    num_tiles = n // tn

    def const(a):
        nd = a.ndim
        return pl.BlockSpec(a.shape, lambda i, b: (0,) * nd)

    in_specs = [
        pl.BlockSpec((cd, tn), lambda i, b: (0, i)),        # coords tile (B-invariant)
        const(freq2pi),
        pl.BlockSpec((1, c, tn), lambda i, b: (b, 0, i)),   # features tile
        pl.BlockSpec((1, h2, 1), lambda i, b: (b, 0, 0)),   # folded z/b1 bias
        const(w1c_all), const(w1s_all), const(w1f_all), const(w2_all), const(b2_all),
    ]
    out_shape = (
        jax.ShapeDtypeStruct((1, 2 * nf, n), jnp.float32),  # enc: written once
        jax.ShapeDtypeStruct((bsz, k2, n), jnp.float32),    # [pi_prior ; pi_post]
    )
    out_specs = [
        pl.BlockSpec((1, 2 * nf, tn), lambda i, b: (0, 0, i)),
        pl.BlockSpec((1, k2, tn), lambda i, b: (b, 0, i)),
    ]

    return pl.pallas_call(
        _fused_cat_kernel,
        out_shape=out_shape,
        grid_spec=pltpu.PrefetchScalarGridSpec(
            num_scalar_prefetch=0,
            grid=(num_tiles, bsz),                           # B innermost -> reuse cache
            in_specs=in_specs,
            out_specs=out_specs,
            scratch_shapes=[pltpu.VMEM((2 * nf, tn), jnp.float32)],
        ),
        compiler_params=pltpu.CompilerParams(
            dimension_semantics=("parallel", "arbitrary")),  # megacore over N tiles
    )(coords_t, freq2pi, feats_cm, zbias_all,
      w1c_all, w1s_all, w1f_all, w2_all, b2_all)


# ----------------------------------------------------------------------------
# Module-equivalent wrapper (deterministic synthetic parameters).
# ----------------------------------------------------------------------------
class VamohBasePallas:
    def __init__(self, key, *, dims_x=(3, 16, 16), coordinate_dim=2,
                 num_frequencies=16, dim_z=32, hidden=32, K=4):
        self.dims_x = dims_x
        self.feature_dim = dims_x[0]
        self.raw_coordinate_dim = coordinate_dim
        self.num_frequencies = num_frequencies
        self.coordinate_dim = 2 * num_frequencies        # after FourierFeatures
        self.dim_z = dim_z
        self.hidden = hidden
        self.K = K
        self.fix_categorical_prior = False               # kwargs default assumed

        ks = jax.random.split(key, 5)
        # FourierFeatures frequency matrix ~ N(0, std^2), std=1.0 (not learned).
        self.frequency_matrix = jax.random.normal(
            ks[0], (num_frequencies, coordinate_dim), jnp.float32)
        self.freq2pi = (2.0 * math.pi) * self.frequency_matrix   # folded at init

        def lin(k, fan_in, fan_out):
            scale = 1.0 / math.sqrt(fan_in)
            return jax.random.uniform(k, (fan_in, fan_out), jnp.float32, -scale, scale)

        nf, C, H = num_frequencies, self.feature_dim, hidden
        # prior_cat_encoder over concat(enc[cos|sin], z)
        din_p = self.coordinate_dim + dim_z
        self.prior_w1 = lin(ks[1], din_p, H)
        self.prior_b1 = jnp.zeros((H,), jnp.float32)
        self.prior_w2 = lin(ks[2], H, K)
        self.prior_b2 = jnp.zeros((K,), jnp.float32)
        # post_cat_encoder over concat(enc[cos|sin], features, z)
        din_q = self.coordinate_dim + C + dim_z
        self.post_w1 = lin(ks[3], din_q, H)
        self.post_b1 = jnp.zeros((H,), jnp.float32)
        self.post_w2 = lin(ks[4], H, K)
        self.post_b2 = jnp.zeros((K,), jnp.float32)

        # ---- kernel-friendly stacked / padded weights (done once at init) ----
        self._w1c_all = jnp.concatenate(
            [self.prior_w1[:nf].T, self.post_w1[:nf].T], axis=0)            # (2H, nf)
        self._w1s_all = jnp.concatenate(
            [self.prior_w1[nf:2 * nf].T, self.post_w1[nf:2 * nf].T], axis=0)  # (2H, nf)
        self._w1f_all = jnp.concatenate(
            [jnp.zeros((H, C), jnp.float32),                                  # prior: no feats
             self.post_w1[2 * nf:2 * nf + C].T], axis=0)                      # (2H, C)
        zK = jnp.zeros((K, H), jnp.float32)
        self._w2_all = jnp.concatenate(
            [jnp.concatenate([self.prior_w2.T, zK], axis=1),
             jnp.concatenate([zK, self.post_w2.T], axis=1)], axis=0)          # (2K, 2H)
        self._b2_all = jnp.concatenate([self.prior_b2, self.post_b2])[:, None]  # (2K, 1)
        # z-row blocks for the tiny host-side z-bias matmul (b1 folded there too)
        self._prior_w1z = self.prior_w1[2 * nf:]                              # (dz, H)
        self._post_w1z = self.post_w1[2 * nf + C:]                            # (dz, H)

    # --- GridDataConverter coordinate grid (shared across the batch) ---------
    def coordinate_grid(self, H, W):
        ys = jnp.linspace(-1.0, 1.0, H, dtype=jnp.float32)
        xs = jnp.linspace(-1.0, 1.0, W, dtype=jnp.float32)
        gy, gx = jnp.meshgrid(ys, xs, indexing="ij")
        return jnp.stack([gy, gx], axis=-1).reshape(H * W, 2)                 # (N, 2)

    # --- fused create_encoded_coordinates_fwd + prior_cat + post_cat ---------
    def categorical_fwd_from_image(self, x_nchw, z):
        """Hot path. x_nchw:[B,C,H,W] z:[B,dz] ->
        enc_t [2F,N] (batch-invariant), pi_prior_t [B,K,N], pi_post_t [B,K,N]."""
        B, C, H, W = x_nchw.shape
        N = H * W
        coords_t = self.coordinate_grid(H, W).T                # (Cd, N)
        feats_cm = x_nchw.reshape(B, C, N)                     # no transpose round trip
        # tiny (B,dz)@(dz,H) matmuls done once in XLA; folds b1 as well
        zb_p = z @ self._prior_w1z + self.prior_b1             # (B, H)
        zb_q = z @ self._post_w1z + self.post_b1               # (B, H)
        zbias = jnp.concatenate([zb_p, zb_q], axis=1)[:, :, None]  # (B, 2H, 1)

        enc_t, pi_all = fused_categorical_call(
            coords_t, self.freq2pi, feats_cm, zbias,
            self._w1c_all, self._w1s_all, self._w1f_all, self._w2_all, self._b2_all)
        K = self.K
        return enc_t[0], pi_all[:, :K, :], pi_all[:, K:, :]

    # --- layout-matching convenience (PyTorch [B,N,*] view; test/debug only) --
    def categorical_fwd(self, x_nchw, z):
        enc_t, pip_t, piq_t = self.categorical_fwd_from_image(x_nchw, z)
        B = x_nchw.shape[0]
        enc = jnp.broadcast_to(enc_t.T[None], (B,) + enc_t.T.shape)   # lazy expand
        return enc, jnp.transpose(pip_t, (0, 2, 1)), jnp.transpose(piq_t, (0, 2, 1))


if __name__ == "__main__":
    key = jax.random.PRNGKey(0)
    k_model, k_x, k_z = jax.random.split(key, 3)

    model = VamohBasePallas(k_model, dims_x=(3, 16, 16), coordinate_dim=2,
                            num_frequencies=16, dim_z=32, hidden=32, K=4)

    # Small synthetic NCHW image batch (like the PyTorch module's input).
    x = jax.random.normal(k_x, (2, 3, 16, 16), jnp.float32)
    z = jax.random.normal(k_z, (2, model.dim_z), jnp.float32)

    # Hot path (feature-major, enc emitted once).
    enc_t, pip_t, piq_t = model.categorical_fwd_from_image(x, z)
    jax.block_until_ready((enc_t, pip_t, piq_t))

    B, C, H, W = x.shape
    N = H * W
    assert enc_t.shape == (2 * model.num_frequencies, N)
    assert pip_t.shape == (B, model.K, N)
    assert piq_t.shape == (B, model.K, N)

    # ---- pure-JAX reference (original concat-based formulation) -------------
    coords = model.coordinate_grid(H, W)                                  # (N, 2)
    feats = jnp.transpose(x.reshape(B, C, N), (0, 2, 1))                  # (B, N, C)
    proj_r = 2.0 * math.pi * (coords @ model.frequency_matrix.T)          # (N, nf)
    enc1 = jnp.concatenate([jnp.cos(proj_r), jnp.sin(proj_r)], axis=-1)   # (N, 2F)
    enc_expected = jnp.broadcast_to(enc1[None], (B, N, enc1.shape[-1]))
    z_rep = jnp.broadcast_to(z[:, None, :], (B, N, model.dim_z))

    def mlp_ref(inp, w1, b1, w2, b2):
        h = jnp.maximum(inp @ w1 + b1, 0.0)
        return jax.nn.softmax(h @ w2 + b2, axis=-1)

    prior_in = jnp.concatenate([enc_expected, z_rep], axis=-1)
    post_in = jnp.concatenate([enc_expected, feats, z_rep], axis=-1)
    pi_prior_expected = mlp_ref(prior_in.reshape(B * N, -1),
                                model.prior_w1, model.prior_b1,
                                model.prior_w2, model.prior_b2).reshape(B, N, model.K)
    pi_post_expected = mlp_ref(post_in.reshape(B * N, -1),
                               model.post_w1, model.post_b1,
                               model.post_w2, model.post_b2).reshape(B, N, model.K)

    # kernel outputs -> [B,N,*] layout for comparison (test-only transposes)
    enc, pi_prior, pi_post = model.categorical_fwd(x, z)
    jax.block_until_ready((enc, pi_prior, pi_post))

    assert bool(jnp.allclose(enc, enc_expected, atol=1e-3))
    assert bool(jnp.allclose(pi_prior, pi_prior_expected, atol=2e-3))
    assert bool(jnp.allclose(pi_post, pi_post_expected, atol=2e-3))
    # exact divide -> softmax rows sum to 1 within f32 rounding
    assert bool(jnp.allclose(jnp.sum(pi_prior, axis=-1), 1.0, atol=1e-4))
    assert bool(jnp.allclose(jnp.sum(pi_post, axis=-1), 1.0, atol=1e-4))

    print("KERNEL_OK")
</pallas_src>

<mosaic_0001>
module attributes {stable_mosaic.version = 11 : i64} {
  func.func @_fused_cat_kernel(%arg0: i32, %arg1: i32, %arg2: memref<2x256xf32, #tpu.memory_space<vmem>>, %arg3: memref<16x2xf32, #tpu.memory_space<vmem>>, %arg4: memref<1x3x256xf32, #tpu.memory_space<vmem>>, %arg5: memref<1x64x1xf32, #tpu.memory_space<vmem>>, %arg6: memref<64x16xf32, #tpu.memory_space<vmem>>, %arg7: memref<64x16xf32, #tpu.memory_space<vmem>>, %arg8: memref<64x3xf32, #tpu.memory_space<vmem>>, %arg9: memref<8x64xf32, #tpu.memory_space<vmem>>, %arg10: memref<8x1xf32, #tpu.memory_space<vmem>>, %arg11: memref<1x32x256xf32, #tpu.memory_space<vmem>>, %arg12: memref<1x8x256xf32, #tpu.memory_space<vmem>>, %arg13: memref<32x256xf32, #tpu.memory_space<vmem>>) attributes {dimension_semantics = [#tpu.dimension_semantics<parallel>, #tpu.dimension_semantics<arbitrary>], iteration_bounds = array<i64: 1, 2>, scalar_prefetch = 0 : i64, scratch_operands = 1 : i64, tpu.core_type = #tpu.core_type<tc>, window_params = [{transform_indices = @transform_0, window_bounds = array<i64: 2, 256>}, {pipeline_mode = #tpu.pipeline_mode<synchronous>, transform_indices = @transform_1, window_bounds = array<i64: 16, 2>}, {transform_indices = @transform_2, window_bounds = array<i64: 1, 3, 256>}, {transform_indices = @transform_3, window_bounds = array<i64: 1, 64, 1>}, {pipeline_mode = #tpu.pipeline_mode<synchronous>, transform_indices = @transform_4, window_bounds = array<i64: 64, 16>}, {pipeline_mode = #tpu.pipeline_mode<synchronous>, transform_indices = @transform_5, window_bounds = array<i64: 64, 16>}, {pipeline_mode = #tpu.pipeline_mode<synchronous>, transform_indices = @transform_6, window_bounds = array<i64: 64, 3>}, {pipeline_mode = #tpu.pipeline_mode<synchronous>, transform_indices = @transform_7, window_bounds = array<i64: 8, 64>}, {pipeline_mode = #tpu.pipeline_mode<synchronous>, transform_indices = @transform_8, window_bounds = array<i64: 8, 1>}, {transform_indices = @transform_9, window_bounds = array<i64: 1, 32, 256>}, {transform_indices = @transform_10, window_bounds = array<i64: 1, 8, 256>}]} {
    %c0_i32 = arith.constant 0 : i32
    %0 = arith.cmpi eq, %arg1, %c0_i32 : i32
    %1 = arith.extui %0 : i1 to i32
    %c0_i32_0 = arith.constant 0 : i32
    %2 = arith.cmpi ne, %1, %c0_i32_0 : i32
    scf.if %2 {
      %c0_25 = arith.constant 0 : index
      %c0_26 = arith.constant 0 : index
      %86 = vector.load %arg3[%c0_25, %c0_26] : memref<16x2xf32, #tpu.memory_space<vmem>>, vector<16x2xf32>
      %c0_27 = arith.constant 0 : index
      %c0_28 = arith.constant 0 : index
      %87 = vector.load %arg2[%c0_27, %c0_28] : memref<2x256xf32, #tpu.memory_space<vmem>>, vector<2x256xf32>
      %88 = vector.extract_strided_slice %86 {offsets = [0, 0], sizes = [16, 1], strides = [1, 1]} : vector<16x2xf32> to vector<16x1xf32>
      %89 = vector.extract_strided_slice %87 {offsets = [0, 0], sizes = [1, 256], strides = [1, 1]} : vector<2x256xf32> to vector<1x256xf32>
      %90 = vector.broadcast %88 : vector<16x1xf32> to vector<16x256xf32>
      %91 = vector.broadcast %89 : vector<1x256xf32> to vector<16x256xf32>
      %92 = arith.mulf %90, %91 : vector<16x256xf32>
      %93 = vector.extract_strided_slice %86 {offsets = [0, 1], sizes = [16, 1], strides = [1, 1]} : vector<16x2xf32> to vector<16x1xf32>
      %94 = vector.extract_strided_slice %87 {offsets = [1, 0], sizes = [1, 256], strides = [1, 1]} : vector<2x256xf32> to vector<1x256xf32>
      %95 = vector.broadcast %93 : vector<16x1xf32> to vector<16x256xf32>
      %96 = vector.broadcast %94 : vector<1x256xf32> to vector<16x256xf32>
      %97 = arith.mulf %95, %96 : vector<16x256xf32>
      %98 = arith.addf %92, %97 : vector<16x256xf32>
      %99 = math.cos %98 : vector<16x256xf32>
      %c0_29 = arith.constant 0 : index
      %c0_30 = arith.constant 0 : index
      %100 = vector.load %arg13[%c0_29, %c0_30] : memref<32x256xf32, #tpu.memory_space<vmem>>, vector<16x256xf32>
      tpu.vector_store %arg13[%c0_29, %c0_30], %99 {strides = array<i32>} : memref<32x256xf32, #tpu.memory_space<vmem>>, vector<16x256xf32>,
      %101 = math.sin %98 : vector<16x256xf32>
      %c16_31 = arith.constant 16 : index
      %c0_32 = arith.constant 0 : index
      %102 = vector.load %arg13[%c16_31, %c0_32] : memref<32x256xf32, #tpu.memory_space<vmem>>, vector<16x256xf32>
      tpu.vector_store %arg13[%c16_31, %c0_32], %101 {strides = array<i32>} : memref<32x256xf32, #tpu.memory_space<vmem>>, vector<16x256xf32>,
      %c0_33 = arith.constant 0 : index
      %c0_34 = arith.constant 0 : index
      %103 = vector.load %arg13[%c0_33, %c0_34] : memref<32x256xf32, #tpu.memory_space<vmem>>, vector<32x256xf32>
      %c0_35 = arith.constant 0 : index
      %c0_36 = arith.constant 0 : index
      %c0_37 = arith.constant 0 : index
      %104 = vector.load %arg11[%c0_35, %c0_36, %c0_37] : memref<1x32x256xf32, #tpu.memory_space<vmem>>, vector<1x32x256xf32>
      %105 = vector.shape_cast %104 : vector<1x32x256xf32> to vector<32x256xf32>
      %106 = vector.shape_cast %103 : vector<32x256xf32> to vector<1x32x256xf32>
      tpu.vector_store %arg11[%c0_35, %c0_36, %c0_37], %106 {strides = array<i32>} : memref<1x32x256xf32, #tpu.memory_space<vmem>>, vector<1x32x256xf32>,
    } else {
    }
    %c0 = arith.constant 0 : index
    %c0_1 = arith.constant 0 : index
    %3 = vector.load %arg13[%c0, %c0_1] : memref<32x256xf32, #tpu.memory_space<vmem>>, vector<16x256xf32>
    %c16 = arith.constant 16 : index
    %c0_2 = arith.constant 0 : index
    %4 = vector.load %arg13[%c16, %c0_2] : memref<32x256xf32, #tpu.memory_space<vmem>>, vector<16x256xf32>
    %c0_3 = arith.constant 0 : index
    %c0_4 = arith.constant 0 : index
    %c0_5 = arith.constant 0 : index
    %5 = vector.load %arg4[%c0_3, %c0_4, %c0_5] : memref<1x3x256xf32, #tpu.memory_space<vmem>>, vector<1x3x256xf32>
    %6 = vector.shape_cast %5 : vector<1x3x256xf32> to vector<3x256xf32>
    %c0_6 = arith.constant 0 : index
    %c0_7 = arith.constant 0 : index
    %7 = vector.load %arg6[%c0_6, %c0_7] : memref<64x16xf32, #tpu.memory_space<vmem>>, vector<64x16xf32>
    %cst = arith.constant dense<0.000000e+00> : vector<64x256xf32>
    %8 = tpu.matmul %7, %3, %cst {dimension_numbers = #tpu.dot_dimension_numbers<[1], [0], [0], [1], [0, 0, 1, 1], [], []>} : vector<64x16xf32>, vector<16x256xf32>, vector<64x256xf32> -> vector<64x256xf32>
    %c0_8 = arith.constant 0 : index
    %c0_9 = arith.constant 0 : index
    %9 = vector.load %arg7[%c0_8, %c0_9] : memref<64x16xf32, #tpu.memory_space<vmem>>, vector<64x16xf32>
    %cst_10 = arith.constant dense<0.000000e+00> : vector<64x256xf32>
    %10 = tpu.matmul %9, %4, %cst_10 {dimension_numbers = #tpu.dot_dimension_numbers<[1], [0], [0], [1], [0, 0, 1, 1], [], []>} : vector<64x16xf32>, vector<16x256xf32>, vector<64x256xf32> -> vector<64x256xf32>
    %11 = arith.addf %8, %10 : vector<64x256xf32>
    %c0_11 = arith.constant 0 : index
    %c0_12 = arith.constant 0 : index
    %12 = vector.load %arg8[%c0_11, %c0_12] : memref<64x3xf32, #tpu.memory_space<vmem>>, vector<64x3xf32>
    %13 = vector.extract_strided_slice %12 {offsets = [0, 0], sizes = [64, 1], strides = [1, 1]} : vector<64x3xf32> to vector<64x1xf32>
    %14 = vector.extract_strided_slice %6 {offsets = [0, 0], sizes = [1, 256], strides = [1, 1]} : vector<3x256xf32> to vector<1x256xf32>
    %15 = vector.broadcast %13 : vector<64x1xf32> to vector<64x256xf32>
    %16 = vector.broadcast %14 : vector<1x256xf32> to vector<64x256xf32>
    %17 = arith.mulf %15, %16 : vector<64x256xf32>
    %18 = arith.addf %11, %17 : vector<64x256xf32>
    %19 = vector.extract_strided_slice %12 {offsets = [0, 1], sizes = [64, 1], strides = [1, 1]} : vector<64x3xf32> to vector<64x1xf32>
    %20 = vector.extract_strided_slice %6 {offsets = [1, 0], sizes = [1, 256], strides = [1, 1]} : vector<3x256xf32> to vector<1x256xf32>
    %21 = vector.broadcast %19 : vector<64x1xf32> to vector<64x256xf32>
    %22 = vector.broadcast %20 : vector<1x256xf32> to vector<64x256xf32>
    %23 = arith.mulf %21, %22 : vector<64x256xf32>
    %24 = arith.addf %18, %23 : vector<64x256xf32>
    %25 = vector.extract_strided_slice %12 {offsets = [0, 2], sizes = [64, 1], strides = [1, 1]} : vector<64x3xf32> to vector<64x1xf32>
    %26 = vector.extract_strided_slice %6 {offsets = [2, 0], sizes = [1, 256], strides = [1, 1]} : vector<3x256xf32> to vector<1x256xf32>
    %27 = vector.broadcast %25 : vector<64x1xf32> to vector<64x256xf32>
    %28 = vector.broadcast %26 : vector<1x256xf32> to vector<64x256xf32>
    %29 = arith.mulf %27, %28 : vector<64x256xf32>
    %30 = arith.addf %24, %29 : vector<64x256xf32>
    %c0_13 = arith.constant 0 : index
    %c0_14 = arith.constant 0 : index
    %c0_15 = arith.constant 0 : index
    %31 = vector.load %arg5[%c0_13, %c0_14, %c0_15] : memref<1x64x1xf32, #tpu.memory_space<vmem>>, vector<1x64x1xf32>
    %32 = vector.shape_cast %31 : vector<1x64x1xf32> to vector<64x1xf32>
    %33 = vector.broadcast %32 : vector<64x1xf32> to vector<64x256xf32>
    %34 = arith.addf %30, %33 : vector<64x256xf32>
    %cst_16 = arith.constant 0.000000e+00 : f32
    %35 = vector.broadcast %cst_16 : f32 to vector<64x256xf32>
    %36 = arith.maximumf %34, %35 : vector<64x256xf32>
    %c0_17 = arith.constant 0 : index
    %c0_18 = arith.constant 0 : index
    %37 = vector.load %arg9[%c0_17, %c0_18] : memref<8x64xf32, #tpu.memory_space<vmem>>, vector<8x64xf32>
    %cst_19 = arith.constant dense<0.000000e+00> : vector<8x256xf32>
    %38 = tpu.matmul %37, %36, %cst_19 {dimension_numbers = #tpu.dot_dimension_numbers<[1], [0], [0], [1], [0, 0, 1, 1], [], []>} : vector<8x64xf32>, vector<64x256xf32>, vector<8x256xf32> -> vector<8x256xf32>
    %c0_20 = arith.constant 0 : index
    %c0_21 = arith.constant 0 : index
    %39 = vector.load %arg10[%c0_20, %c0_21] : memref<8x1xf32, #tpu.memory_space<vmem>>, vector<8x1xf32>
    %40 = vector.broadcast %39 : vector<8x1xf32> to vector<8x256xf32>
    %41 = arith.addf %38, %40 : vector<8x256xf32>
    %42 = vector.extract_strided_slice %41 {offsets = [0, 0], sizes = [4, 256], strides = [1, 1]} : vector<8x256xf32> to vector<4x256xf32>
    %43 = vector.extract_strided_slice %42 {offsets = [0, 0], sizes = [1, 256], strides = [1, 1]} : vector<4x256xf32> to vector<1x256xf32>
    %44 = vector.extract_strided_slice %42 {offsets = [1, 0], sizes = [1, 256], strides = [1, 1]} : vector<4x256xf32> to vector<1x256xf32>
    %45 = arith.maximumf %43, %44 : vector<1x256xf32>
    %46 = vector.extract_strided_slice %42 {offsets = [2, 0], sizes = [1, 256], strides = [1, 1]} : vector<4x256xf32> to vector<1x256xf32>
    %47 = arith.maximumf %45, %46 : vector<1x256xf32>
    %48 = vector.extract_strided_slice %42 {offsets = [3, 0], sizes = [1, 256], strides = [1, 1]} : vector<4x256xf32> to vector<1x256xf32>
    %49 = arith.maximumf %47, %48 : vector<1x256xf32>
    %50 = vector.broadcast %49 : vector<1x256xf32> to vector<4x256xf32>
    %51 = arith.subf %42, %50 : vector<4x256xf32>
    %52 = math.exp %51 : vector<4x256xf32>
    %53 = vector.extract_strided_slice %52 {offsets = [0, 0], sizes = [1, 256], strides = [1, 1]} : vector<4x256xf32> to vector<1x256xf32>
    %54 = vector.extract_strided_slice %52 {offsets = [1, 0], sizes = [1, 256], strides = [1, 1]} : vector<4x256xf32> to vector<1x256xf32>
    %55 = arith.addf %53, %54 : vector<1x256xf32>
    %56 = vector.extract_strided_slice %52 {offsets = [2, 0], sizes = [1, 256], strides = [1, 1]} : vector<4x256xf32> to vector<1x256xf32>
    %57 = arith.addf %55, %56 : vector<1x256xf32>
    %58 = vector.extract_strided_slice %52 {offsets = [3, 0], sizes = [1, 256], strides = [1, 1]} : vector<4x256xf32> to vector<1x256xf32>
    %59 = arith.addf %57, %58 : vector<1x256xf32>
    %60 = vector.broadcast %59 : vector<1x256xf32> to vector<4x256xf32>
    %61 = arith.divf %52, %60 : vector<4x256xf32>
    %62 = vector.extract_strided_slice %41 {offsets = [4, 0], sizes = [4, 256], strides = [1, 1]} : vector<8x256xf32> to vector<4x256xf32>
    %63 = vector.extract_strided_slice %62 {offsets = [0, 0], sizes = [1, 256], strides = [1, 1]} : vector<4x256xf32> to vector<1x256xf32>
    %64 = vector.extract_strided_slice %62 {offsets = [1, 0], sizes = [1, 256], strides = [1, 1]} : vector<4x256xf32> to vector<1x256xf32>
    %65 = arith.maximumf %63, %64 : vector<1x256xf32>
    %66 = vector.extract_strided_slice %62 {offsets = [2, 0], sizes = [1, 256], strides = [1, 1]} : vector<4x256xf32> to vector<1x256xf32>
    %67 = arith.maximumf %65, %66 : vector<1x256xf32>
    %68 = vector.extract_strided_slice %62 {offsets = [3, 0], sizes = [1, 256], strides = [1, 1]} : vector<4x256xf32> to vector<1x256xf32>
    %69 = arith.maximumf %67, %68 : vector<1x256xf32>
    %70 = vector.broadcast %69 : vector<1x256xf32> to vector<4x256xf32>
    %71 = arith.subf %62, %70 : vector<4x256xf32>
    %72 = math.exp %71 : vector<4x256xf32>
    %73 = vector.extract_strided_slice %72 {offsets = [0, 0], sizes = [1, 256], strides = [1, 1]} : vector<4x256xf32> to vector<1x256xf32>
    %74 = vector.extract_strided_slice %72 {offsets = [1, 0], sizes = [1, 256], strides = [1, 1]} : vector<4x256xf32> to vector<1x256xf32>
    %75 = arith.addf %73, %74 : vector<1x256xf32>
    %76 = vector.extract_strided_slice %72 {offsets = [2, 0], sizes = [1, 256], strides = [1, 1]} : vector<4x256xf32> to vector<1x256xf32>
    %77 = arith.addf %75, %76 : vector<1x256xf32>
    %78 = vector.extract_strided_slice %72 {offsets = [3, 0], sizes = [1, 256], strides = [1, 1]} : vector<4x256xf32> to vector<1x256xf32>
    %79 = arith.addf %77, %78 : vector<1x256xf32>
    %80 = vector.broadcast %79 : vector<1x256xf32> to vector<4x256xf32>
    %81 = arith.divf %72, %80 : vector<4x256xf32>
    %82 = tpu.concatenate %61, %81 in 0 : vector<4x256xf32>, vector<4x256xf32> -> vector<8x256xf32>
    %c0_22 = arith.constant 0 : index
    %c0_23 = arith.constant 0 : index
    %c0_24 = arith.constant 0 : index
    %83 = vector.load %arg12[%c0_22, %c0_23, %c0_24] : memref<1x8x256xf32, #tpu.memory_space<vmem>>, vector<1x8x256xf32>
    %84 = vector.shape_cast %83 : vector<1x8x256xf32> to vector<8x256xf32>
    %85 = vector.shape_cast %82 : vector<8x256xf32> to vector<1x8x256xf32>
    tpu.vector_store %arg12[%c0_22, %c0_23, %c0_24], %85 {strides = array<i32>} : memref<1x8x256xf32, #tpu.memory_space<vmem>>, vector<1x8x256xf32>,
    return
  }
  func.func @transform_0(%arg0: i32, %arg1: i32) -> (i32, i32) {
    %c0_i32 = arith.constant 0 : i32
    %c0_i32_0 = arith.constant 0 : i32
    return %c0_i32, %arg0 : i32, i32
  }
  func.func @transform_1(%arg0: i32, %arg1: i32) -> (i32, i32) {
    %c0_i32 = arith.constant 0 : i32
    %c0_i32_0 = arith.constant 0 : i32
    %c0_i32_1 = arith.constant 0 : i32
    return %c0_i32, %c0_i32_0 : i32, i32
  }
  func.func @transform_2(%arg0: i32, %arg1: i32) -> (i32, i32, i32) {
    %c0_i32 = arith.constant 0 : i32
    %c0_i32_0 = arith.constant 0 : i32
    return %arg1, %c0_i32, %arg0 : i32, i32, i32
  }
  func.func @transform_3(%arg0: i32, %arg1: i32) -> (i32, i32, i32) {
    %c0_i32 = arith.constant 0 : i32
    %c0_i32_0 = arith.constant 0 : i32
    %c0_i32_1 = arith.constant 0 : i32
    return %arg1, %c0_i32, %c0_i32_0 : i32, i32, i32
  }
  func.func @transform_4(%arg0: i32, %arg1: i32) -> (i32, i32) {
    %c0_i32 = arith.constant 0 : i32
    %c0_i32_0 = arith.constant 0 : i32
    %c0_i32_1 = arith.constant 0 : i32
    return %c0_i32, %c0_i32_0 : i32, i32
  }
  func.func @transform_5(%arg0: i32, %arg1: i32) -> (i32, i32) {
    %c0_i32 = arith.constant 0 : i32
    %c0_i32_0 = arith.constant 0 : i32
    %c0_i32_1 = arith.constant 0 : i32
    return %c0_i32, %c0_i32_0 : i32, i32
  }
  func.func @transform_6(%arg0: i32, %arg1: i32) -> (i32, i32) {
    %c0_i32 = arith.constant 0 : i32
    %c0_i32_0 = arith.constant 0 : i32
    %c0_i32_1 = arith.constant 0 : i32
    return %c0_i32, %c0_i32_0 : i32, i32
  }
  func.func @transform_7(%arg0: i32, %arg1: i32) -> (i32, i32) {
    %c0_i32 = arith.constant 0 : i32
    %c0_i32_0 = arith.constant 0 : i32
    %c0_i32_1 = arith.constant 0 : i32
    return %c0_i32, %c0_i32_0 : i32, i32
  }
  func.func @transform_8(%arg0: i32, %arg1: i32) -> (i32, i32) {
    %c0_i32 = arith.constant 0 : i32
    %c0_i32_0 = arith.constant 0 : i32
    %c0_i32_1 = arith.constant 0 : i32
    return %c0_i32, %c0_i32_0 : i32, i32
  }
  func.func @transform_9(%arg0: i32, %arg1: i32) -> (i32, i32, i32) {
    %c0_i32 = arith.constant 0 : i32
    %c0_i32_0 = arith.constant 0 : i32
    %c0_i32_1 = arith.constant 0 : i32
    return %c0_i32, %c0_i32_0, %arg0 : i32, i32, i32
  }
  func.func @transform_10(%arg0: i32, %arg1: i32) -> (i32, i32, i32) {
    %c0_i32 = arith.constant 0 : i32
    %c0_i32_0 = arith.constant 0 : i32
    return %arg1, %c0_i32, %arg0 : i32, i32, i32
  }
}

</mosaic_0001>

<bundles_post_ra>
// kernel: tpu_custom_call.1
= control target key start
LH: loop header
LB: loop body
LE: loop exit
PB: predicated region body
PF: predicated region fallthrough
CT: control target
= control target key end

     0   :  { %16 = vsyncpa [#allocation4], 0  ;;  %s4019_s0 = inlined_call_operand.vmem [shape: f32[2,256], index: 0, kind: input, shape index: {}]   ;;  %s4020_s1 = inlined_call_operand.vmem [shape: f32[16,2], index: 1, kind: input, shape index: {}]   ;;  %s4021_s2 = inlined_call_operand.vmem [shape: f32[2,3,256], index: 2, kind: input, shape index: {}]   ;;  %s4022_s3 = inlined_call_operand.vmem [shape: f32[2,64,1], index: 3, kind: input, shape index: {}]   ;;  %s4023_s4 = inlined_call_operand.vmem [shape: f32[64,16], index: 4, kind: input, shape index: {}]   ;;  %s4024_s5 = inlined_call_operand.vmem [shape: f32[64,16], index: 5, kind: input, shape index: {}]   ;;  %s4025_s6 = inlined_call_operand.vmem [shape: f32[64,3], index: 6, kind: input, shape index: {}]   ;;  %s4026_s7 = inlined_call_operand.vmem [shape: f32[8,64], index: 7, kind: input, shape index: {}]   ;;  %s4027_s8 = inlined_call_operand.vmem [shape: f32[8,1], index: 8, kind: input, shape index: {}]   ;;  %s4028_s9 = inlined_call_operand.hbm [shape: f32[1,32,256], index: 9, kind: output, shape index: {0}]   ;;  %s4029_s10 = inlined_call_operand.hbm [shape: f32[2,8,256], index: 10, kind: output, shape index: {1}]  }
   0x1   :  { %17 = vsyncpa [#allocation6], 0 }
   0x2   :  { %19 = vsyncpa [#allocation6 + $0x1], 0  ;;  %s3015_s13 = smov 0   ;;  %s3017_s14 = smov 0  }
   0x3   :  { %s3019_s15 = smov 0   ;;  %s3021_s16 = smov 0  }
   0x4   :  { %s3023_s17 = smov 0   ;;  %s3025_s18 = smov 0  }
   0x5 LB: > { %4036 = sst [smem:[#allocation9_spill]] %s2932_s15  ;;  %s2642_s19 = sadd.s32 4294967295, %s2944_s18   ;;  %s2944_s18 = sphi %s3025_s18, %s25_s18   ;;  %s2940_s17 = sphi %s3023_s17, %s4081_s17   ;;  %s2936_s16 = sphi %s3021_s16, %s4080_s16   ;;  %s2932_s15 = sphi %s3019_s15, %s4079_s15   ;;  %s2928_s14 = sphi %s3017_s14, %s4083_s14   ;;  %s2924_s13 = sphi %s3015_s13, %s4082_s13  }
   0x6   : > { %4037 = sst [smem:[#allocation10_spill]] %s2940_s17  ;;  %s2643_s20 = sadd.s32 4294967294, %s2944_s18  }
   0x7   : > { %s34_s21 = sadd.s32 1, %s2940_s17  ;;  %s278_s22 = sadd.s32 1, %s2932_s15 }
   0x8   : > { %p35_p0 = scmp.ge.s32.totalorder %s34_s21, 2  ;;  %p288_p1 = scmp.ne.s32.totalorder %s2932_s15, %s2928_s14 }
   0x9   : > { %p3051_p2 = scmp.eq.s32.totalorder %s2642_s19, 1  ;;  %p294_p3 = scmp.ne.s32.totalorder %s2928_s14, %s2924_s13 }
   0xa   : > { %s4085_s21 = smov (%p35_p0, %s34_s21), 0  ;;  %p295_p5 = scmp.eq.s32.totalorder %s2643_s20, 1 }
   0xb   : > { %4039 = sst [smem:[#allocation11_spill]] %s4085_s21  ;;  %p3061_p4 = por %p3051_p2, %p288_p1 }
   0xc   : > { %s273_s25 = ssub.s32 %s2940_s17, %s4085_s21  ;;  %p2647_p6 = scmp.ge.s32.totalorder %s2944_s18, 1 }
   0xd   : > { %p276_p7 = scmp.eq.s32.totalorder %s273_s25, 0  ;;  %p3068_p8 = por %p295_p5, %p294_p3 }
   0xe   : > { %p361_p9 = scmp.lt.s32.totalorder %s2944_s18, 3 }
   0xf   : > { %s3074_s27 = scalar_select %p276_p7, %s2932_s15, %s278_s22  }
  0x10   : > { %p362_p10 = pnand %p2647_p6, %p361_p9 }
  0x11   : > { %4042 = sst [smem:[#allocation12_spill]] %s3074_s27 }
  0x12   : > { %365 = sbr.rel (%p362_p10) target bundleno = 760 (0x2f8), region = 56 }
  0x17   : > { %s4033_s28 = sand.u32 1, %s2928_s14   ;;  %p420_p11 = scmp.lt.s32.totalorder %s2936_s16, 1 }
  0x18   : > { %s2648_s29 = sshll.u32 %s4033_s28, 4  ;;  %p2653_p12 = scmp.ne.s32.totalorder %s2936_s16, 0 }
  0x19   : > { %s421_s30 = scalar_select %p420_p11, %s2936_s16, 1 }
  0x1a   : > { %s3091_s27 = scalar_lea.vmem [#allocation5], %s2648_s29  ;;  %439 = sbr.rel (%p2653_p12) target bundleno = 351 (0x15f), region = 60 }
  0x1b   : > { %s2719_s11 = sshll.u32 %s421_s30, 3  ;;  %s2720_s12 = sshll.u32 %s421_s30, 6 }
  0x1c   : > { %s3084_s25 = scalar_lea.vmem %s4021_s2, %s2719_s11  ;;  %s3089_s17 = scalar_lea.vmem %s4022_s3, %s2720_s12 }
  0x1f   : > { %v440_v0 = vld [vmem:[%s4020_s1] sm:$0xff]  ;;  %v2946_v1 = vmov 1   ;;  %v2947_v2 = vmov 0   ;;  %v441_v3 = vld [vmem:[%s4020_s1 + $0x8] sm:$0xff]  ;;  %v2948_v52 = vmov 683565275  }
  0x20   : > { %2798 = vset.pattern.permute.xlu1 %v2946_v1  ;;  %2797 = vset.pattern.permute.xlu0 %v2947_v2  ;;  %v442_v4 = vld [vmem:[%s4019_s0] sm:$0xf]  ;;  %v2949_v54 = vmov 2475754826   ;;  %v2950_v58 = vmov 2131351028  }
  0x21   : > { %465 = vperm.xlu1 %2798, %v440_v0   ;;  %445 = vperm.xlu0 %2797, %v440_v0   ;;  %v472_v5 = vperm.slane %v442_v4, 1  ;;  %v473_v6 = vperm.slane %v442_v4, 3  ;;  %v454_v7 = vperm.slane %v442_v4, 0  ;;  %v455_v8 = vperm.slane %v442_v4, 2 }
  0x22   : > { %v2951_v61 = vmov 2102212464   ;;  %v2952_v0 = vmov 920167782   ;;  %v2953_v4 = vmov 1326507024  }
  0x23   : > { %v476_v9 = vperm.slane %v472_v5, 1  ;;  %v477_v10 = vperm.slane %v473_v6, 1  ;;  %v458_v11 = vperm.slane %v454_v7, 0  ;;  %v459_v12 = vperm.slane %v455_v8, 0 }
  0x29   : > { %469 = vperm.xlu1 %2798, %v441_v3   ;;  %450 = vperm.xlu0 %2797, %v441_v3  }
  0x31   : > { %2799 = vset.pattern.permute.xlu0 %v2946_v1 }
  0x93   : > { %v466_v13 = vpop.permute.xlu1 %465  ;;  %v446_v14 = vpop.permute.xlu0 %445 }
  0x94   : > { %v478_v15 = vmul.f32 %v476_v9, %v466_v13  ;;  %v479_v16 = vmul.f32 %v477_v10, %v466_v13  ;;  %v460_v17 = vmul.f32 %v458_v11, %v446_v14  ;;  %v461_v18 = vmul.f32 %v459_v12, %v446_v14 }
  0x96   : > { %v3104_v19 = vadd.f32 %v478_v15, %v460_v17  ;;  %v3106_v20 = vadd.f32 %v479_v16, %v461_v18 }
  0x98   : > { %v486_v21 = vand.u32 2147483647, %v3104_v19  ;;  %v489_v22 = vand.u32 2139095040, %v3104_v19  ;;  %v640_v23 = vand.u32 2147483647, %v3106_v20  ;;  %v643_v24 = vand.u32 2139095040, %v3106_v20 }
  0x9a   : > { %v490_v25 = vshrl.u32 %v489_v22, 23  ;;  %v493_v26 = vand.u32 8388607, %v486_v21  ;;  %v644_v27 = vshrl.u32 %v643_v24, 23  ;;  %v647_v28 = vand.u32 8388607, %v640_v23 }
  0x9b   : > { %v470_v29 = vpop.permute.xlu1 %469  ;;  %v451_v30 = vpop.permute.xlu0 %450 }
  0x9c   : > { %v2654_v31 = vadd.s32 4294967169, %v490_v25  ;;  %v494_v32 = vor.u32 8388608, %v493_v26  ;;  %v480_v33 = vmul.f32 %v476_v9, %v470_v29  ;;  %v481_v34 = vmul.f32 %v477_v10, %v470_v29 }
  0x9d   : > { %v2657_v35 = vadd.s32 4294967169, %v644_v27  ;;  %v462_v36 = vmul.f32 %v458_v11, %v451_v30  ;;  %v463_v37 = vmul.f32 %v459_v12, %v451_v30  ;;  %v648_v43 = vor.u32 8388608, %v647_v28 }
  0x9e   : > { %v496_v38 = vadd.s32 1, %v2654_v31  ;;  %v3120_v42 = vshll.u32 %v494_v32, 8 }
  0x9f   : > { %v650_v39 = vadd.s32 1, %v2657_v35  ;;  %v3116_v40 = vadd.f32 %v480_v33, %v462_v36  ;;  %v3118_v41 = vadd.f32 %v481_v34, %v463_v37  ;;  %v3127_v50 = vshll.u32 %v648_v43, 8 }
  0xa0   : > { %vm497_vm0 = vcmp.gt.s32.totalorder %v496_v38, 0  ;;  %v3123_v48 = vand.u32 65535, %v3120_v42  ;;  %v536_v56 = vshrl.u32 %v3120_v42, 16 }
  0xa1   : > { %v498_v44 = vsel %vm497_vm0, %v496_v38, 0  ;;  %vm651_vm1 = vcmp.gt.s32.totalorder %v650_v39, 0 }
  0xa2   : > { %v500_v45 = vand.u32 31, %v498_v44  ;;  %v652_v46 = vsel %vm651_vm1, %v650_v39, 0  ;;  %v3129_v51 = vshrl.u32 %v498_v44, 5 }
  0xa3   : > { %v3125_v49 = vand.u32 31, %v652_v46  ;;  %v3174_v36 = vshrl.u32 %v652_v46, 5 }
  0xa4   : > { %v501_v47 = vsub.s32 32, %v500_v45  ;;  %v503_v53 = vshll.u32 %v2948_v52, %v500_v45  ;;  %v506_v55 = vshll.u32 %v2949_v54, %v500_v45  ;;  %v509_v60 = vshll.u32 %v2950_v58, %v500_v45 }
  0xa5   : > { %v512_v63 = vshll.u32 %v2951_v61, %v500_v45  ;;  %v515_v3 = vshll.u32 %v2952_v0, %v500_v45  ;;  %v3143_v9 = vsub.s32 32, %v3125_v49  ;;  %vm518_vm2 = vcmp.lt.s32.totalorder %v3129_v51, 1 }
  0xa6   : > { %v504_v57 = vshrl.u32 %v2949_v54, %v501_v47  ;;  %v507_v59 = vshrl.u32 %v2950_v58, %v501_v47  ;;  %v510_v62 = vshrl.u32 %v2951_v61, %v501_v47  ;;  %v513_v1 = vshrl.u32 %v2952_v0, %v501_v47 }
  0xa7   : > { %v516_v5 = vshrl.u32 %v2953_v4, %v501_v47  ;;  %vm519_vm3 = vcmp.lt.s32.totalorder %v3129_v51, 2  ;;  %v502_v12 = vshrl.u32 %v2948_v52, %v501_v47  ;;  %vm521_vm4 = vcmp.lt.s32.totalorder %v3129_v51, 4 }
  0xa8   : > { %v505_v6 = vor.u32 %v504_v57, %v503_v53  ;;  %v508_v7 = vor.u32 %v507_v59, %v506_v55  ;;  %v511_v8 = vor.u32 %v510_v62, %v509_v60  ;;  %v514_v10 = vor.u32 %v513_v1, %v512_v63 }
  0xa9   : > { %v517_v11 = vor.u32 %v516_v5, %v515_v3  ;;  %vm520_vm5 = vcmp.lt.s32.totalorder %v3129_v51, 3  ;;  %v657_v17 = vshll.u32 %v2948_v52, %v3125_v49  ;;  %v658_v25 = vshrl.u32 %v2949_v54, %v3143_v9 }
  0xaa   : > { %v526_v13 = vsel %vm518_vm2, %v505_v6, %v508_v7  ;;  %v530_v14 = vsel %vm518_vm2, %v508_v7, %v511_v8  ;;  %v527_v15 = vsel %vm521_vm4, %v514_v10, 920167782  ;;  %v523_v18 = vsel %vm521_vm4, %v511_v8, 2102212464 }
  0xab   : > { %v531_v16 = vsel %vm521_vm4, %v517_v11, 1326507024  ;;  %v528_v22 = vsel %vm520_vm5, %v511_v8, %v527_v15  ;;  %v660_v28 = vshll.u32 %v2949_v54, %v3125_v49  ;;  %v661_v29 = vshrl.u32 %v2950_v58, %v3143_v9 }
  0xac   : > { %v532_v24 = vsel %vm520_vm5, %v514_v10, %v531_v16  ;;  %v529_v26 = vsel %vm519_vm3, %v526_v13, %v528_v22  ;;  %v522_v34 = vsel %vm518_vm2, %v502_v12, %v505_v6  ;;  %v524_v35 = vsel %vm520_vm5, %v508_v7, %v523_v18 }
  0xad   : > { %v533_v27 = vsel %vm519_vm3, %v530_v14, %v532_v24  ;;  %v559_v32 = vand.u32 65535, %v529_v26  ;;  %v560_v33 = vshrl.u32 %v529_v26, 16  ;;  %v3176_v37 = vor.u32 %v658_v25, %v657_v17 }
  0xae   : > { %v537_v30 = vand.u32 65535, %v533_v27  ;;  %v538_v31 = vshrl.u32 %v533_v27, 16  ;;  %v3179_v43 = vor.u32 %v661_v29, %v660_v28  ;;  %v664_v44 = vshrl.u32 %v2951_v61, %v3143_v9 }
  0xaf   : > { %v562_v47 = vmul.u32 %v560_v33, %v3123_v48  ;;  %v563_v53 = vmul.u32 %v559_v32, %v536_v56  ;;  %v663_v55 = vshll.u32 %v2950_v58, %v3125_v49  ;;  %v561_v59 = vmul.u32 %v559_v32, %v3123_v48 }
  0xb0   : > { %v540_v38 = vmul.u32 %v538_v31, %v3123_v48  ;;  %v541_v39 = vmul.u32 %v537_v30, %v536_v56  ;;  %v539_v45 = vmul.u32 %v537_v30, %v3123_v48  ;;  %v542_v46 = vmul.u32 %v538_v31, %v536_v56 }
  0xb1   : > { %v564_v60 = vmul.u32 %v560_v33, %v536_v56  ;;  %v565_v3 = vshll.u32 %v562_v47, 16  ;;  %v567_v6 = vshll.u32 %v563_v53, 16  ;;  %v3188_v7 = vor.u32 %v664_v44, %v663_v55 }
  0xb2   : > { %v543_v57 = vshll.u32 %v540_v38, 16  ;;  %v544_v62 = vshrl.u32 %v540_v38, 16  ;;  %v545_v63 = vshll.u32 %v541_v39, 16  ;;  %v546_v1 = vshrl.u32 %v541_v39, 16 }
  0xb3   : > { %vm569_vm7 = vc.u32 %v561_v59, %v565_v3  ;;  %v571_v10 = vadd.s32 %v565_v3, %v561_v59  ;;  %v667_v11 = vshrl.u32 %v2952_v0, %v3143_v9  ;;  %v666_v56 = vshll.u32 %v2951_v61, %v3125_v49 }
  0xb4   : > { %vm547_vm6 = vc.u32 %v539_v45, %v543_v57  ;;  %v549_v5 = vadd.s32 %v543_v57, %v539_v45  ;;  %v570_v48 = vsel %vm569_vm7, 1, %v2947_v2  ;;  %v669_v15 = vshll.u32 %v2952_v0, %v3125_v49 }
  0xb5   : > { %v548_v8 = vsel %vm547_vm6, 1, %v2947_v2  ;;  %v572_v14 = vadd.s32 %v570_v48, %v564_v60  ;;  %vm573_vm9 = vc.u32 %v571_v10, %v567_v6  ;;  %v668_v18 = vor.u32 %v667_v11, %v666_v56 }
  0xb6   : > { %v550_v12 = vadd.s32 %v548_v8, %v542_v46  ;;  %vm551_vm8 = vc.u32 %v549_v5, %v545_v63  ;;  %v574_v17 = vsel %vm573_vm9, 1, %v2947_v2  ;;  %v670_v22 = vshrl.u32 %v2953_v4, %v3143_v9 }
  0xb7   : > { %v552_v13 = vsel %vm551_vm8, 1, %v2947_v2  ;;  %v566_v24 = vshrl.u32 %v562_v47, 16  ;;  %v568_v25 = vshrl.u32 %v563_v53, 16  ;;  %v3202_v26 = vadd.s32 %v571_v10, %v567_v6 }
  0xb8   : > { %v554_v16 = vadd.s32 %v552_v13, %v550_v12  ;;  %v576_v27 = vadd.s32 %v574_v17, %v572_v14  ;;  %v671_v29 = vor.u32 %v670_v22, %v669_v15  ;;  %vm672_vm10 = vcmp.lt.s32.totalorder %v3174_v36, 1 }
  0xb9   : > { %vm675_vm11 = vcmp.lt.s32.totalorder %v3174_v36, 4  ;;  %vm674_vm12 = vcmp.lt.s32.totalorder %v3174_v36, 3  ;;  %v680_v49 = vsel %vm672_vm10, %v3176_v37, %v3179_v43  ;;  %vm673_vm13 = vcmp.lt.s32.totalorder %v3174_v36, 2 }
  0xba   : > { %v555_v28 = vadd.s32 %v554_v16, %v544_v62  ;;  %v577_v30 = vadd.s32 %v576_v27, %v566_v24  ;;  %v681_v31 = vsel %vm675_vm11, %v668_v18, 920167782  ;;  %v684_v38 = vsel %vm672_vm10, %v3179_v43, %v3188_v7 }
  0xbb   : > { %v682_v33 = vsel %vm674_vm12, %v3188_v7, %v681_v31  ;;  %v525_v39 = vsel %vm519_vm3, %v522_v34, %v524_v35  ;;  %v685_v47 = vsel %vm675_vm11, %v671_v29, 1326507024  ;;  %v689_v55 = vand.u32 65535, %v3127_v50 }
  0xbc   : > { %v3213_v32 = vadd.s32 %v555_v28, %v546_v1  ;;  %v578_v44 = vadd.s32 %v577_v30, %v568_v25  ;;  %v683_v45 = vsel %vm673_vm13, %v680_v49, %v682_v33  ;;  %v686_v53 = vsel %vm674_vm12, %v668_v18, %v685_v47 }
  0xbd   : > { %v713_v46 = vand.u32 65535, %v683_v45  ;;  %v687_v51 = vsel %vm673_vm13, %v684_v38, %v686_v53  ;;  %v690_v34 = vshrl.u32 %v3127_v50, 16  ;;  %v714_v35 = vshrl.u32 %v683_v45, 16 }
  0xbe   : > { %vm581_vm14 = vc.u32 %v3213_v32, %v3202_v26  ;;  %v582_v57 = vadd.s32 1, %v578_v44  ;;  %v579_v59 = vmul.u32 %v3120_v42, %v525_v39  ;;  %v691_v60 = vand.u32 65535, %v687_v51 }
  0xbf   : > { %v692_v62 = vshrl.u32 %v687_v51, 16  ;;  %v716_v1 = vmul.u32 %v714_v35, %v689_v55  ;;  %v717_v3 = vmul.u32 %v713_v46, %v690_v34  ;;  %v715_v10 = vmul.u32 %v713_v46, %v689_v55 }
  0xc0   : > { %v583_v63 = vsel %vm581_vm14, %v582_v57, %v578_v44  ;;  %v695_v8 = vmul.u32 %v691_v60, %v690_v34  ;;  %v718_v11 = vmul.u32 %v714_v35, %v690_v34  ;;  %v797_v48 = vand.u32 2139095040, %v3116_v40 }
  0xc1   : > { %v584_v5 = vadd.s32 %v583_v63, %v579_v59  ;;  %v694_v6 = vmul.u32 %v692_v62, %v689_v55  ;;  %v719_v12 = vshll.u32 %v716_v1, 16  ;;  %v693_v13 = vmul.u32 %v691_v60, %v689_v55 }
  0xc2   : > { %v696_v14 = vmul.u32 %v692_v62, %v690_v34  ;;  %v699_v16 = vshll.u32 %v695_v8, 16  ;;  %v721_v17 = vshll.u32 %v717_v3, 16  ;;  %v677_v29 = vsel %vm675_vm11, %v3188_v7, 2102212464 }
  0xc3   : > { %v585_v56 = vadd.s32 536870912, %v584_v5  ;;  %v697_v15 = vshll.u32 %v694_v6, 16  ;;  %vm723_vm15 = vc.u32 %v715_v10, %v719_v12  ;;  %v725_v42 = vadd.s32 %v719_v12, %v715_v10 }
  0xc4   : > { %v724_v24 = vsel %vm723_vm15, 1, %v2947_v2  ;;  %v656_v49 = vshrl.u32 %v2948_v52, %v3143_v9  ;;  %v798_v38 = vshrl.u32 %v797_v48, 23  ;;  %v698_v44 = vshrl.u32 %v694_v6, 16 }
  0xc5   : > { %v586_v18 = vshrl.u32 %v585_v56, 30  ;;  %vm701_vm0 = vc.u32 %v693_v13, %v697_v15  ;;  %v703_v22 = vadd.s32 %v697_v15, %v693_v13  ;;  %v726_v27 = vadd.s32 %v724_v24, %v718_v11 }
  0xc6   : > { %v702_v25 = vsel %vm701_vm0, 1, %v2947_v2  ;;  %vm727_vm1 = vc.u32 %v725_v42, %v721_v17  ;;  %v676_v53 = vsel %vm672_vm10, %v656_v49, %v3176_v37  ;;  %v678_v7 = vsel %vm674_vm12, %v3179_v43, %v677_v29 }
  0xc7   : > { %v587_v28 = vshll.u32 %v586_v18, 30  ;;  %v704_v30 = vadd.s32 %v702_v25, %v696_v14  ;;  %vm705_vm2 = vc.u32 %v703_v22, %v699_v16  ;;  %v728_v33 = vsel %vm727_vm1, 1, %v2947_v2 }
  0xc8   : > { %v706_v31 = vsel %vm705_vm2, 1, %v2947_v2  ;;  %v730_v47 = vadd.s32 %v728_v33, %v726_v27  ;;  %v720_v55 = vshrl.u32 %v716_v1, 16  ;;  %v2660_v46 = vadd.s32 4294967169, %v798_v38 }
  0xc9   : > { %v588_v39 = vsub.s32 %v584_v5, %v587_v28  ;;  %v708_v45 = vadd.s32 %v706_v31, %v704_v30  ;;  %v700_v51 = vshrl.u32 %v695_v8, 16  ;;  %v722_v34 = vshrl.u32 %v717_v3, 16 }
  0xca   : > { %v731_v35 = vadd.s32 %v730_v47, %v720_v55  ;;  %v804_v59 = vadd.s32 1, %v2660_v46  ;;  %v610_v62 = vsub.s32 4, %v586_v18  ;;  %v679_v63 = vsel %vm673_vm13, %v676_v53, %v678_v7 }
  0xcb   : > { %vm589_vm3 = vcmp.lt.s32.totalorder %v588_v39, 0  ;;  %v590_v9 = vsub.s32 0, %v588_v39  ;;  %v709_v57 = vadd.s32 %v708_v45, %v698_v44  ;;  %v794_v37 = vand.u32 2147483647, %v3116_v40 }
  0xcc   : > { %v3259_v43 = vadd.s32 %v725_v42, %v721_v17  ;;  %v732_v1 = vadd.s32 %v731_v35, %v722_v34  ;;  %vm805_vm4 = vcmp.gt.s32.totalorder %v804_v59, 0  ;;  %vm488_vm5 = vcmp.lt.s32.totalorder %v3104_v19, 0 }
  0xcd   : > { %v591_v60 = vsel %vm589_vm3, %v590_v9, %v588_v39  ;;  %v3257_v6 = vadd.s32 %v709_v57, %v700_v51  ;;  %v611_v36 = vsel %vm488_vm5, %v610_v62, %v586_v18  ;;  %v733_v10 = vmul.u32 %v3127_v50, %v679_v63 }
  0xce   : > { %v592_v5 = vclz %v591_v60  ;;  %v736_v3 = vadd.s32 1, %v732_v1  ;;  %v801_v11 = vand.u32 8388607, %v794_v37  ;;  %v806_v12 = vsel %vm805_vm4, %v804_v59, 0 }
  0xcf   : > { %vm735_vm6 = vc.u32 %v3257_v6, %v3259_v43  ;;  %v808_v56 = vand.u32 31, %v806_v12  ;;  %vm3271_vm8 = vcmp.le.f32.partialorder %v486_v21, 0.7853982  ;;  %v580_v14 = vadd.s32 %v3202_v26, %v3213_v32 }
  0xd0   : > { %v2655_v8 = vadd.s32 4294967294, %v592_v5  ;;  %v737_v48 = vsel %vm735_vm6, %v736_v3, %v732_v1  ;;  %v613_v42 = vsel %vm3271_vm8, 0, %v611_v36  ;;  %v802_v24 = vor.u32 8388608, %v801_v11 }
  0xd1   : > { %v738_v16 = vadd.s32 %v737_v48, %v733_v10  ;;  %v3279_v18 = vsub.s32 32, %v808_v56  ;;  %v3281_v28 = vand.u32 3, %v613_v42  ;;  %v1250_v26 = vadd.s32 3, %v613_v42 }
  0xd2   : > { %vm2656_vm7 = vcmp.lt.s32.totalorder %v2655_v8, 0  ;;  %vm642_vm9 = vcmp.lt.s32.totalorder %v3106_v20, 0  ;;  %v3292_v45 = vshrl.u32 %v806_v12, 5  ;;  %v811_v47 = vshll.u32 %v2948_v52, %v808_v56 }
  0xd3   : > { %v595_v15 = vsel %vm2656_vm7, 0, %v2655_v8  ;;  %v739_v22 = vadd.s32 536870912, %v738_v16  ;;  %v812_v32 = vshrl.u32 %v2949_v54, %v3279_v18  ;;  %v815_v33 = vshrl.u32 %v2950_v58, %v3279_v18 }
  0xd4   : > { %v596_v17 = vsub.s32 32, %v595_v15  ;;  %v600_v50 = vsub.s32 4294967266, %v595_v15  ;;  %v597_v25 = vshll.u32 %v588_v39, %v595_v15  ;;  %v821_v38 = vshrl.u32 %v2952_v0, %v3279_v18 }
  0xd5   : > { %v740_v29 = vshrl.u32 %v739_v22, 30  ;;  %v3290_v39 = vshll.u32 %v802_v24, 8  ;;  %v814_v53 = vshll.u32 %v2949_v54, %v808_v56  ;;  %v817_v55 = vshll.u32 %v2950_v58, %v808_v56 }
  0xd6   : > { %v598_v27 = vshrl.u32 %v580_v14, %v596_v17  ;;  %v601_v21 = vadd.s32 127, %v600_v50  ;;  %v818_v46 = vshrl.u32 %v2951_v61, %v3279_v18  ;;  %v820_v9 = vshll.u32 %v2951_v61, %v808_v56 }
  0xd7   : > { %v741_v31 = vshll.u32 %v740_v29, 30  ;;  %v813_v34 = vor.u32 %v812_v32, %v811_v47  ;;  %v824_v35 = vshrl.u32 %v2953_v4, %v3279_v18  ;;  %vm3306_vm10 = vcmp.le.f32.partialorder %v640_v23, 0.7853982 }
  0xd8   : > { %v599_v30 = vor.u32 %v598_v27, %v597_v25  ;;  %v602_v49 = vshll.u32 %v601_v21, 23  ;;  %v3312_v62 = vor.u32 %v815_v33, %v814_v53  ;;  %v822_v63 = vor.u32 %v821_v38, %v820_v9 }
  0xd9   : > { %v3296_v7 = vsub.s32 %v738_v16, %v741_v31  ;;  %v764_v1 = vsub.s32 4, %v740_v29  ;;  %v3314_v8 = vand.u32 3, %v1250_v26  ;;  %v823_v3 = vshll.u32 %v2952_v0, %v808_v56 }
  0xda   : > { %v603_v44 = vor.u32 4788187, %v602_v49  ;;  %v606_v51 = vcvt.s32.f32 %v599_v30  ;;  %v819_v10 = vor.u32 %v818_v46, %v817_v55  ;;  %vm826_vm12 = vcmp.lt.s32.totalorder %v3292_v45, 1 }
  0xdb   : > { %vm743_vm11 = vcmp.lt.s32.totalorder %v3296_v7, 0  ;;  %v744_v60 = vsub.s32 0, %v3296_v7  ;;  %v843_v23 = vand.u32 65535, %v3290_v39  ;;  %v825_v48 = vor.u32 %v824_v35, %v823_v3 }
  0xdc   : > { %v604_v57 = vand.u32 2147483647, %v603_v44  ;;  %vm829_vm13 = vcmp.lt.s32.totalorder %v3292_v45, 4  ;;  %v734_v14 = vadd.s32 %v3259_v43, %v3257_v6  ;;  %v834_v15 = vsel %vm826_vm12, %v813_v34, %v3312_v62 }
  0xdd   : > { %v745_v36 = vsel %vm743_vm11, %v744_v60, %v3296_v7  ;;  %v835_v56 = vsel %vm829_vm13, %v822_v63, 920167782  ;;  %v844_v16 = vshrl.u32 %v3290_v39, 16  ;;  %v765_v42 = vsel %vm642_vm9, %v764_v1, %v740_v29 }
  0xde   : > { %v607_v5 = vmul.f32 %v606_v51, %v604_v57  ;;  %v746_v12 = vclz %v745_v36  ;;  %vm828_vm14 = vcmp.lt.s32.totalorder %v3292_v45, 3  ;;  %vm827_vm15 = vcmp.lt.s32.totalorder %v3292_v45, 2 }
  0xdf   : > { %v836_v43 = vsel %vm828_vm14, %v819_v10, %v835_v56  ;;  %v838_v22 = vsel %vm826_vm12, %v3312_v62, %v819_v10  ;;  %v839_v13 = vsel %vm829_vm13, %v825_v48, 1326507024  ;;  %v810_v21 = vshrl.u32 %v2948_v52, %v3279_v18 }
  0xe0   : > { %v608_v11 = vxor.u32 2147483648, %v607_v5  ;;  %v2658_v50 = vadd.s32 4294967294, %v746_v12  ;;  %v837_v25 = vsel %vm827_vm15, %v834_v15, %v836_v43  ;;  %v840_v29 = vsel %vm828_vm14, %v822_v63, %v839_v13 }
  0xe1   : > { %v868_v30 = vshrl.u32 %v837_v25, 16  ;;  %v3357_v31 = vsel %vm3306_vm10, 0, %v765_v42  ;;  %v841_v44 = vsel %vm827_vm15, %v838_v22, %v840_v29  ;;  %v867_v47 = vand.u32 65535, %v837_v25 }
  0xe2   : > { %v609_v17 = vsel %vm488_vm5, %v608_v11, %v607_v5  ;;  %vm2659_vm0 = vcmp.lt.s32.totalorder %v2658_v50, 0  ;;  %v845_v46 = vand.u32 65535, %v841_v44  ;;  %v3364_v57 = vsel %vm826_vm12, %v810_v21, %v813_v34 }
  0xe3   : > { %v3337_v6 = vsel %vm3271_vm8, %v3104_v19, %v609_v17  ;;  %v749_v27 = vsel %vm2659_vm0, 0, %v2658_v50  ;;  %v846_v51 = vshrl.u32 %v841_v44, 16  ;;  %v3366_v35 = vmul.u32 %v868_v30, %v843_v23 }
  0xe4   : > { %v614_v24 = vmul.f32 %v3337_v6, %v3337_v6  ;;  %v750_v32 = vsub.s32 32, %v749_v27  ;;  %v751_v33 = vshll.u32 %v3296_v7, %v749_v27  ;;  %v754_v38 = vsub.s32 4294967266, %v749_v27 }
  0xe5   : > { %v3370_v5 = vsel %vm829_vm13, %v819_v10, 2102212464  ;;  %vm635_vm1 = vcmp.eq.s32.totalorder %v3281_v28, 2  ;;  %v848_v3 = vmul.u32 %v846_v51, %v843_v23  ;;  %v3373_v36 = vmul.u32 %v845_v46, %v844_v16 }
  0xe6   : > { %v615_v49 = vmul.f32 -0.001358992, %v614_v24  ;;  %v622_v26 = vmul.f32 -0.00019511016, %v614_v24  ;;  %v752_v55 = vshrl.u32 %v734_v14, %v750_v32  ;;  %v755_v9 = vadd.s32 127, %v754_v38 }
  0xe7   : > { %v869_v11 = vmul.u32 %v867_v47, %v843_v23  ;;  %vm1256_vm2 = vcmp.eq.s32.totalorder %v3314_v8, 2  ;;  %v3376_v48 = vmul.u32 %v867_v47, %v844_v16  ;;  %v872_v14 = vmul.u32 %v868_v30, %v844_v16 }
  0xe8   : > { %v616_v53 = vadd.f32 0.041655596, %v615_v49  ;;  %v623_v18 = vadd.f32 0.008332121, %v622_v26  ;;  %v753_v7 = vor.u32 %v752_v55, %v751_v33  ;;  %v756_v1 = vshll.u32 %v755_v9, 23 }
  0xe9   : > { %vm632_vm3 = vcmp.eq.s32.totalorder %v3281_v28, 0  ;;  %vm1253_vm4 = vcmp.eq.s32.totalorder %v3314_v8, 0  ;;  %v847_v10 = vmul.u32 %v845_v46, %v843_v23  ;;  %v851_v56 = vshll.u32 %v848_v3, 16 }
  0xea   : > { %v617_v60 = vmul.f32 %v616_v53, %v614_v24  ;;  %v624_v63 = vmul.f32 %v623_v18, %v614_v24  ;;  %v757_v15 = vor.u32 4788187, %v756_v1  ;;  %v873_v17 = vshll.u32 %v3366_v35, 16 }
  0xeb   : > { %vm631_vm5 = vcmp.lt.s32.totalorder %v3281_v28, 2  ;;  %v760_v43 = vcvt.s32.f32 %v753_v7  ;;  %vm1252_vm6 = vcmp.lt.s32.totalorder %v3314_v8, 2  ;;  %v850_v22 = vmul.u32 %v846_v51, %v844_v16 }
  0xec   : > { %v618_v12 = vadd.f32 -0.4999988, %v617_v60  ;;  %v625_v34 = vadd.f32 -0.16666654, %v624_v63  ;;  %vm629_vm7 = vweird.f32 %v3104_v19  ;;  %v758_v25 = vand.u32 2147483647, %v757_v15 }
  0xed   : > { %v853_v13 = vshll.u32 %v3373_v36, 16  ;;  %vm855_vm8 = vc.u32 %v847_v10, %v851_v56  ;;  %v857_v27 = vadd.s32 %v851_v56, %v847_v10  ;;  %v852_v29 = vshrl.u32 %v848_v3, 16 }
  0xee   : > { %v619_v50 = vmul.f32 %v618_v12, %v614_v24  ;;  %v626_v42 = vmul.f32 %v625_v34, %v614_v24  ;;  %v856_v30 = vsel %vm855_vm8, 1, %v2947_v2  ;;  %v761_v49 = vmul.f32 %v760_v43, %v758_v25 }
  0xef   : > { %v858_v24 = vadd.s32 %v856_v30, %v850_v22  ;;  %vm859_vm11 = vc.u32 %v857_v27, %v853_v13  ;;  %vm877_vm12 = vc.u32 %v869_v11, %v873_v17  ;;  %v875_v47 = vshll.u32 %v3376_v48, 16 }
  0xf0   : > { %v620_v21 = vadd.f32 1.0, %v619_v50  ;;  %v627_v23 = vadd.f32 1.0, %v626_v42  ;;  %v860_v16 = vsel %vm859_vm11, 1, %v2947_v2  ;;  %v878_v33 = vsel %vm877_vm12, 1, %v2947_v2 }
  0xf1   : > { %v762_v38 = vxor.u32 2147483648, %v761_v49  ;;  %v862_v44 = vadd.s32 %v860_v16, %v858_v24  ;;  %v879_v53 = vadd.s32 %v873_v17, %v869_v11  ;;  %v854_v46 = vshrl.u32 %v3373_v36, 16 }
  0xf2   : > { %v628_v26 = vmul.f32 %v627_v23, %v3337_v6  ;;  %v636_v32 = vxor.u32 2147483648, %v620_v21  ;;  %v880_v9 = vadd.s32 %v878_v33, %v872_v14  ;;  %v874_v34 = vshrl.u32 %v3366_v35, 16 }
  0xf3   : > { %v763_v6 = vsel %vm642_vm9, %v762_v38, %v761_v49  ;;  %v863_v60 = vadd.s32 %v862_v44, %v852_v29  ;;  %vm881_vm13 = vc.u32 %v879_v53, %v875_v47  ;;  %v951_v10 = vand.u32 2139095040, %v3118_v41 }
  0xf4   : > { %v633_v18 = vxor.u32 2147483648, %v628_v26  ;;  %v637_v55 = vsel %vm635_vm1, %v636_v32, %v628_v26  ;;  %v1258_v51 = vsel %vm1256_vm2, %v636_v32, %v628_v26  ;;  %v766_v7 = vsel %vm3306_vm10, %v3106_v20, %v763_v6 }
  0xf5   : > { %v882_v3 = vsel %vm881_vm13, 1, %v2947_v2  ;;  %v768_v11 = vmul.f32 %v766_v7, %v766_v7  ;;  %v832_v28 = vsel %vm828_vm14, %v3312_v62, %v3370_v5  ;;  %v3419_v8 = vadd.s32 %v863_v60, %v854_v46 }
  0xf6   : > { %v634_v63 = vsel %vm632_vm3, %v620_v21, %v633_v18  ;;  %v1255_v1 = vsel %vm1253_vm4, %v620_v21, %v633_v18  ;;  %v884_v15 = vadd.s32 %v882_v3, %v880_v9  ;;  %v876_v35 = vshrl.u32 %v3376_v48, 16 }
  0xf7   : > { %v638_v36 = vsel %vm631_vm5, %v634_v63, %v637_v55  ;;  %v1259_v12 = vsel %vm1252_vm6, %v1255_v1, %v1258_v51  ;;  %v769_v56 = vmul.f32 -0.001358992, %v768_v11  ;;  %v776_v17 = vmul.f32 -0.00019511016, %v768_v11 }
  0xf8   : > { %v639_v14 = vsel %vm629_vm7, nan, %v638_v36  ;;  %v1260_v59 = vsel %vm629_vm7, nan, %v1259_v12  ;;  %v885_v50 = vadd.s32 %v884_v15, %v874_v34  ;;  %v952_v42 = vshrl.u32 %v951_v10, 23 }
  0xf9   : > { %1102 = vst [vmem:[#allocation2 + $0x30] sm:$0xff] %v639_v14  ;;  %v770_v19 = vadd.f32 0.041655596, %v769_v56  ;;  %v777_v43 = vadd.f32 0.008332121, %v776_v17  ;;  %v3422_v22 = vadd.s32 %v879_v53, %v875_v47  ;;  %v1405_v25 = vadd.s32 3, %v3357_v31 }
  0xfa   : > { %1726 = vst [vmem:[#allocation2 + $0x8] sm:$0xff] %v1260_v59  ;;  %v833_v13 = vsel %vm827_vm15, %v3364_v57, %v832_v28  ;;  %v886_v62 = vadd.s32 %v885_v50, %v876_v35  ;;  %v2663_v5 = vadd.s32 4294967169, %v952_v42  ;;  %v784_v48 = vand.u32 3, %v3357_v31 }
  0xfb   : > { %1738 = vst [vmem:[#allocation3] sm:$0xff] %v639_v14  ;;  %v771_v27 = vmul.f32 %v770_v19, %v768_v11  ;;  %v778_v21 = vmul.f32 %v777_v43, %v768_v11  ;;  %vm889_vm9 = vc.u32 %v3419_v8, %v3422_v22  ;;  %v948_v29 = vand.u32 2147483647, %v3118_v41 }
  0xfc   : > { %1742 = vst [vmem:[#allocation3 + $0x20] sm:$0xff] %v1260_v59  ;;  %v890_v23 = vadd.s32 1, %v886_v62  ;;  %v958_v30 = vadd.s32 1, %v2663_v5  ;;  %v887_v26 = vmul.u32 %v3290_v39, %v833_v13  ;;  %v1406_v32 = vand.u32 3, %v1405_v25 }
  0xfd   : > { %v772_v49 = vadd.f32 -0.4999988, %v771_v27  ;;  %v779_v24 = vadd.f32 -0.16666654, %v778_v21  ;;  %vm783_vm14 = vweird.f32 %v3106_v20  ;;  %vm785_vm15 = vcmp.lt.s32.totalorder %v784_v48, 2 }
  0xfe   : > { %v891_v45 = vsel %vm889_vm9, %v890_v23, %v886_v62  ;;  %vm959_vm10 = vcmp.gt.s32.totalorder %v958_v30, 0  ;;  %v955_v31 = vand.u32 8388607, %v948_v29  ;;  %vm786_vm0 = vcmp.eq.s32.totalorder %v784_v48, 0 }
  0xff   : > { %v773_v57 = vmul.f32 %v772_v49, %v768_v11  ;;  %v780_v16 = vmul.f32 %v779_v24, %v768_v11  ;;  %v892_v33 = vadd.s32 %v891_v45, %v887_v26  ;;  %v960_v38 = vsel %vm959_vm10, %v958_v30, 0 }
 0x100   : > { %v962_v44 = vand.u32 31, %v960_v38  ;;  %vm789_vm1 = vcmp.eq.s32.totalorder %v784_v48, 2  ;;  %vm1407_vm2 = vcmp.lt.s32.totalorder %v1406_v32, 2  ;;  %vm1408_vm3 = vcmp.eq.s32.totalorder %v1406_v32, 0 }
 0x101   : > { %v774_v47 = vadd.f32 1.0, %v773_v57  ;;  %v781_v53 = vadd.f32 1.0, %v780_v16  ;;  %v893_v18 = vadd.s32 536870912, %v892_v33  ;;  %vm1411_vm4 = vcmp.eq.s32.totalorder %v1406_v32, 2 }
 0x102   : > { %v3436_v39 = vsub.s32 32, %v962_v44  ;;  %v956_v6 = vor.u32 8388608, %v955_v31  ;;  %v3440_v51 = vshrl.u32 %v960_v38, 5  ;;  %v965_v60 = vshll.u32 %v2948_v52, %v962_v44 }
 0x103   : > { %v782_v55 = vmul.f32 %v781_v53, %v766_v7  ;;  %v790_v46 = vxor.u32 2147483648, %v774_v47  ;;  %v3438_v9 = vshrl.u32 %v893_v18, 30  ;;  %v968_v36 = vshll.u32 %v2949_v54, %v962_v44 }
 0x104   : > { %v966_v63 = vshrl.u32 %v2949_v54, %v3436_v39  ;;  %v971_v11 = vshll.u32 %v2950_v58, %v962_v44  ;;  %v969_v34 = vshrl.u32 %v2950_v58, %v3436_v39  ;;  %v972_v14 = vshrl.u32 %v2951_v61, %v3436_v39 }
 0x105   : > { %v787_v1 = vxor.u32 2147483648, %v782_v55  ;;  %v895_v3 = vshll.u32 %v3438_v9, 30  ;;  %v791_v7 = vsel %vm789_vm1, %v790_v46, %v782_v55  ;;  %v1413_v12 = vsel %vm1411_vm4, %v790_v46, %v782_v55 }
 0x106   : > { %v975_v56 = vshrl.u32 %v2952_v0, %v3436_v39  ;;  %v3459_v28 = vor.u32 %v966_v63, %v965_v60  ;;  %v974_v35 = vshll.u32 %v2951_v61, %v962_v44  ;;  %v3466_v19 = vor.u32 %v969_v34, %v968_v36 }
 0x107   : > { %v788_v59 = vsel %vm786_vm0, %v774_v47, %v787_v1  ;;  %v1410_v15 = vsel %vm1408_vm3, %v774_v47, %v787_v1  ;;  %v896_v10 = vsub.s32 %v892_v33, %v895_v3  ;;  %v977_v25 = vshll.u32 %v2952_v0, %v962_v44 }
 0x108   : > { %v792_v54 = vsel %vm785_vm15, %v788_v59, %v791_v7  ;;  %v1414_v17 = vsel %vm1407_vm2, %v1410_v15, %v1413_v12  ;;  %v976_v43 = vor.u32 %v975_v56, %v974_v35  ;;  %v978_v13 = vshrl.u32 %v2953_v4, %v3436_v39 }
 0x109   : > { %v793_v58 = vsel %vm783_vm14, nan, %v792_v54  ;;  %v1415_v50 = vsel %vm783_vm14, nan, %v1414_v17  ;;  %vm897_vm5 = vcmp.lt.s32.totalorder %v896_v10, 0  ;;  %v898_v42 = vsub.s32 0, %v896_v10 }
 0x10a   : > { %1103 = vst [vmem:[#allocation2] sm:$0xff] %v793_v58  ;;  %v973_v61 = vor.u32 %v972_v14, %v971_v11  ;;  %v979_v27 = vor.u32 %v978_v13, %v977_v25  ;;  %v3471_v21 = vshll.u32 %v956_v6, 8  ;;  %v888_v20 = vadd.s32 %v3422_v22, %v3419_v8 }
 0x10b   : > { %1727 = vst [vmem:[#allocation2 + $0x20] sm:$0xff] %v1415_v50  ;;  %v899_v62 = vsel %vm897_vm5, %v898_v42, %v896_v10  ;;  %vm980_vm6 = vcmp.lt.s32.totalorder %v3440_v51, 1  ;;  %vm983_vm7 = vcmp.lt.s32.totalorder %v3440_v51, 4  ;;  %vm982_vm8 = vcmp.lt.s32.totalorder %v3440_v51, 3 }
 0x10c   : > { %1739 = vst [vmem:[#allocation3 + $0x8] sm:$0xff] %v793_v58  ;;  %v900_v5 = vclz %v899_v62  ;;  %v988_v4 = vsel %vm980_vm6, %v3459_v28, %v3466_v19  ;;  %v989_v48 = vsel %vm983_vm7, %v976_v43, 920167782  ;;  %vm981_vm11 = vcmp.lt.s32.totalorder %v3440_v51, 2 }
 0x10d   : > { %1743 = vst [vmem:[#allocation3 + $0x28] sm:$0xff] %v1415_v50  ;;  %v990_v8 = vsel %vm982_vm8, %v973_v61, %v989_v48  ;;  %v992_v22 = vsel %vm980_vm6, %v3466_v19, %v973_v61  ;;  %v993_v23 = vsel %vm983_vm7, %v979_v27, 1326507024  ;;  %v997_v24 = vand.u32 65535, %v3471_v21 }
 0x10e   : > { %v2661_v0 = vadd.s32 4294967294, %v900_v5  ;;  %v991_v30 = vsel %vm981_vm11, %v988_v4, %v990_v8  ;;  %v994_v49 = vsel %vm982_vm8, %v976_v43, %v993_v23  ;;  %v998_v38 = vshrl.u32 %v3471_v21, 16 }
 0x10f   : > { %v995_v32 = vsel %vm981_vm11, %v992_v22, %v994_v49  ;;  %v1021_v45 = vand.u32 65535, %v991_v30  ;;  %v1022_v57 = vshrl.u32 %v991_v30, 16  ;;  %v964_v60 = vshrl.u32 %v2948_v52, %v3436_v39 }
 0x110   : > { %vm2662_vm12 = vcmp.lt.s32.totalorder %v2661_v0, 0  ;;  %v999_v31 = vand.u32 65535, %v995_v32  ;;  %v1000_v47 = vshrl.u32 %v995_v32, 16  ;;  %v985_v11 = vsel %vm983_vm7, %v973_v61, 2102212464 }
 0x111   : > { %v903_v26 = vsel %vm2662_vm12, 0, %v2661_v0  ;;  %v1024_v53 = vmul.u32 %v1022_v57, %v997_v24  ;;  %v1025_v6 = vmul.u32 %v1021_v45, %v998_v38  ;;  %v1023_v7 = vmul.u32 %v1021_v45, %v997_v24 }
 0x112   : > { %v904_v16 = vsub.s32 32, %v903_v26  ;;  %v908_v33 = vsub.s32 4294967266, %v903_v26  ;;  %v905_v44 = vshll.u32 %v896_v10, %v903_v26  ;;  %v1003_v46 = vmul.u32 %v999_v31, %v998_v38 }
 0x113   : > { %v1002_v63 = vmul.u32 %v1000_v47, %v997_v24  ;;  %v1027_v1 = vshll.u32 %v1024_v53, 16  ;;  %v1001_v12 = vmul.u32 %v999_v31, %v997_v24  ;;  %v1004_v34 = vmul.u32 %v1000_v47, %v998_v38 }
 0x114   : > { %v906_v18 = vshrl.u32 %v888_v20, %v904_v16  ;;  %v909_v55 = vadd.s32 127, %v908_v33  ;;  %v1026_v59 = vmul.u32 %v1022_v57, %v998_v38  ;;  %v1007_v10 = vshll.u32 %v1003_v46, 16 }
 0x115   : > { %v1005_v14 = vshll.u32 %v1002_v63, 16  ;;  %v1029_v56 = vshll.u32 %v1025_v6, 16  ;;  %vm1031_vm13 = vc.u32 %v1023_v7, %v1027_v1  ;;  %v1033_v39 = vadd.s32 %v1027_v1, %v1023_v7 }
 0x116   : > { %v907_v3 = vor.u32 %v906_v18, %v905_v44  ;;  %v910_v36 = vshll.u32 %v909_v55, 23  ;;  %v1032_v52 = vsel %vm1031_vm13, 1, %v2947_v2  ;;  %v984_v42 = vsel %vm980_vm6, %v964_v60, %v3459_v28 }
 0x117   : > { %vm1009_vm9 = vc.u32 %v1001_v12, %v1005_v14  ;;  %v1011_v54 = vadd.s32 %v1005_v14, %v1001_v12  ;;  %v1034_v50 = vadd.s32 %v1032_v52, %v1026_v59  ;;  %vm1035_vm14 = vc.u32 %v1033_v39, %v1029_v56 }
 0x118   : > { %v911_v15 = vor.u32 4788187, %v910_v36  ;;  %v914_v35 = vcvt.s32.f32 %v907_v3  ;;  %v1010_v58 = vsel %vm1009_vm9, 1, %v2947_v2  ;;  %v986_v13 = vsel %vm982_vm8, %v3466_v19, %v985_v11 }
 0x119   : > { %v1012_v43 = vadd.s32 %v1010_v58, %v1004_v34  ;;  %vm1013_vm10 = vc.u32 %v1011_v54, %v1007_v10  ;;  %v1036_v61 = vsel %vm1035_vm14, 1, %v2947_v2  ;;  %v1006_v5 = vshrl.u32 %v1002_v63, 16 }
 0x11a   : > { %v912_v17 = vand.u32 2147483647, %v911_v15  ;;  %v1014_v62 = vsel %vm1013_vm10, 1, %v2947_v2  ;;  %v1028_v20 = vshrl.u32 %v1024_v53, 16  ;;  %v1038_v0 = vadd.s32 %v1036_v61, %v1034_v50 }
 0x11b   : > { %v1016_v27 = vadd.s32 %v1014_v62, %v1012_v43  ;;  %vm796_vm15 = vcmp.lt.s32.totalorder %v3116_v40, 0  ;;  %v1008_v28 = vshrl.u32 %v1003_v46, 16  ;;  %v1030_v8 = vshrl.u32 %v1025_v6, 16 }
 0x11c   : > { %v915_v25 = vmul.f32 %v914_v35, %v912_v17  ;;  %v1039_v22 = vadd.s32 %v1038_v0, %v1028_v20  ;;  %vm3517_vm0 = vcmp.le.f32.partialorder %v794_v37, 0.7853982  ;;  %v987_v19 = vsel %vm981_vm11, %v984_v42, %v986_v13 }
 0x11d   : > { %v1017_v48 = vadd.s32 %v1016_v27, %v1006_v5  ;;  %v1037_v24 = vadd.s32 %v1033_v39, %v1029_v56  ;;  %v1041_v16 = vmul.u32 %v3471_v21, %v987_v19  ;;  %v918_v33 = vsub.s32 4, %v3438_v9 }
 0x11e   : > { %v916_v4 = vxor.u32 2147483648, %v915_v25  ;;  %v1040_v26 = vadd.s32 %v1039_v22, %v1030_v8  ;;  %vm937_vm6 = vweird.f32 %v3116_v40  ;;  %vm950_vm13 = vcmp.lt.s32.totalorder %v3118_v41, 0 }
 0x11f   : > { %v1018_v49 = vadd.s32 %v1017_v48, %v1008_v28  ;;  %v919_v55 = vsel %vm796_vm15, %v918_v33, %v3438_v9  ;;  %vm949_vm9 = vcmp.le.f32.partialorder %v948_v29, 0.7853982 }
 0x120   : > { %v917_v2 = vsel %vm796_vm15, %v916_v4, %v915_v25  ;;  %v1044_v45 = vadd.s32 1, %v1040_v26  ;;  %v921_v63 = vsel %vm3517_vm0, 0, %v919_v55 }
 0x121   : > { %v920_v30 = vsel %vm3517_vm0, %v3116_v40, %v917_v2  ;;  %vm1043_vm1 = vc.u32 %v1018_v49, %v1037_v24  ;;  %v938_v12 = vand.u32 3, %v921_v63  ;;  %v1560_v52 = vadd.s32 3, %v921_v63 }
 0x122   : > { %v922_v32 = vmul.f32 %v920_v30, %v920_v30  ;;  %v1045_v38 = vsel %vm1043_vm1, %v1044_v45, %v1040_v26  ;;  %v1042_v42 = vadd.s32 %v1037_v24, %v1018_v49 }
 0x123   : > { %v1046_v44 = vadd.s32 %v1045_v38, %v1041_v16  ;;  %vm940_vm3 = vcmp.eq.s32.totalorder %v938_v12, 0  ;;  %vm943_vm4 = vcmp.eq.s32.totalorder %v938_v12, 2  ;;  %vm939_vm5 = vcmp.lt.s32.totalorder %v938_v12, 2 }
 0x124   : > { %v923_v37 = vmul.f32 -0.001358992, %v922_v32  ;;  %v930_v57 = vmul.f32 -0.00019511016, %v922_v32  ;;  %v1561_v50 = vand.u32 3, %v1560_v52 }
 0x125   : > { %v1047_v18 = vadd.s32 536870912, %v1046_v44 }
 0x126   : > { %v924_v31 = vadd.f32 0.041655596, %v923_v37  ;;  %v931_v51 = vadd.f32 0.008332121, %v930_v57  ;;  %vm1562_vm8 = vcmp.lt.s32.totalorder %v1561_v50, 2  ;;  %vm1563_vm11 = vcmp.eq.s32.totalorder %v1561_v50, 0 }
 0x127   : > { %v1048_v60 = vshrl.u32 %v1047_v18, 30  ;;  %vm1566_vm12 = vcmp.eq.s32.totalorder %v1561_v50, 2 }
 0x128   : > { %v925_v47 = vmul.f32 %v924_v31, %v922_v32  ;;  %v932_v53 = vmul.f32 %v931_v51, %v922_v32 }
 0x129   : > { %v1049_v3 = vshll.u32 %v1048_v60, 30 }
 0x12a   : > { %v926_v46 = vadd.f32 -0.4999988, %v925_v47  ;;  %v933_v6 = vadd.f32 -0.16666654, %v932_v53 }
 0x12b   : > { %v1050_v7 = vsub.s32 %v1046_v44, %v1049_v3 }
 0x12c   : > { %v927_v21 = vmul.f32 %v926_v46, %v922_v32  ;;  %v934_v1 = vmul.f32 %v933_v6, %v922_v32 }
 0x12d   : > { %vm1051_vm2 = vcmp.lt.s32.totalorder %v1050_v7, 0  ;;  %v1052_v59 = vsub.s32 0, %v1050_v7 }
 0x12e   : > { %v928_v36 = vadd.f32 1.0, %v927_v21  ;;  %v935_v11 = vadd.f32 1.0, %v934_v1 }
 0x12f   : > { %v1053_v10 = vsel %vm1051_vm2, %v1052_v59, %v1050_v7 }
 0x130   : > { %v936_v34 = vmul.f32 %v935_v11, %v920_v30  ;;  %v944_v14 = vxor.u32 2147483648, %v928_v36  ;;  %v1054_v9 = vclz %v1053_v10  ;;  %v1072_v30 = vsub.s32 4, %v1048_v60 }
 0x132   : > { %v941_v15 = vxor.u32 2147483648, %v936_v34  ;;  %v945_v54 = vsel %vm943_vm4, %v944_v14, %v936_v34  ;;  %v2664_v17 = vadd.s32 4294967294, %v1054_v9  ;;  %v1568_v0 = vsel %vm1566_vm12, %v944_v14, %v936_v34 }
 0x133   : > { %v1073_v40 = vsel %vm950_vm13, %v1072_v30, %v1048_v60 }
 0x134   : > { %v942_v56 = vsel %vm940_vm3, %v928_v36, %v941_v15  ;;  %vm2665_vm7 = vcmp.lt.s32.totalorder %v2664_v17, 0  ;;  %v1565_v20 = vsel %vm1563_vm11, %v928_v36, %v941_v15  ;;  %v1075_v57 = vsel %vm949_vm9, 0, %v1073_v40 }
 0x135   : > { %v946_v39 = vsel %vm939_vm5, %v942_v56, %v945_v54  ;;  %v1057_v58 = vsel %vm2665_vm7, 0, %v2664_v17  ;;  %v1569_v4 = vsel %vm1562_vm8, %v1565_v20, %v1568_v0  ;;  %v1715_v51 = vadd.s32 3, %v1075_v57 }
 0x136   : > { %v947_v35 = vsel %vm937_vm6, nan, %v946_v39  ;;  %v1058_v43 = vsub.s32 32, %v1057_v58  ;;  %v1062_v25 = vsub.s32 4294967266, %v1057_v58  ;;  %v1059_v13 = vshll.u32 %v1050_v7, %v1057_v58 }
 0x137   : > { %1104 = vst [vmem:[#allocation2 + $0x18] sm:$0xff] %v947_v35  ;;  %v1570_v48 = vsel %vm937_vm6, nan, %v1569_v4  ;;  %v1092_v18 = vand.u32 3, %v1075_v57  ;;  %v1716_v55 = vand.u32 3, %v1715_v51  ;;  %vm1091_vm3 = vweird.f32 %v3118_v41 }
 0x138   : > { %1740 = vst [vmem:[#allocation3 + $0x10] sm:$0xff] %v947_v35  ;;  %v1060_v62 = vshrl.u32 %v1042_v42, %v1058_v43  ;;  %v1063_v61 = vadd.s32 127, %v1062_v25 }
 0x139   : > { %1728 = vst [vmem:[#allocation2 + $0x28] sm:$0xff] %v1570_v48  ;;  %vm1093_vm10 = vcmp.lt.s32.totalorder %v1092_v18, 2  ;;  %vm1094_vm14 = vcmp.eq.s32.totalorder %v1092_v18, 0  ;;  %vm1097_vm15 = vcmp.eq.s32.totalorder %v1092_v18, 2  ;;  %vm1717_vm0 = vcmp.lt.s32.totalorder %v1716_v55, 2 }
 0x13a   : > { %v1061_v5 = vor.u32 %v1060_v62, %v1059_v13  ;;  %v1064_v27 = vshll.u32 %v1063_v61, 23  ;;  %1744 = vst [vmem:[#allocation3 + $0x30] sm:$0xff] %v1570_v48  ;;  %vm1718_vm1 = vcmp.eq.s32.totalorder %v1716_v55, 0  ;;  %vm1721_vm2 = vcmp.eq.s32.totalorder %v1716_v55, 2 }
 0x13c   : > { %v1065_v28 = vor.u32 4788187, %v1064_v27  ;;  %v1068_v22 = vcvt.s32.f32 %v1061_v5 }
 0x13e   : > { %v1066_v8 = vand.u32 2147483647, %v1065_v28 }
 0x140   : > { %v1069_v23 = vmul.f32 %v1068_v22, %v1066_v8 }
 0x142   : > { %v1070_v2 = vxor.u32 2147483648, %v1069_v23 }
 0x144   : > { %v1071_v19 = vsel %vm950_vm13, %v1070_v2, %v1069_v23 }
 0x145   : > { %v1074_v49 = vsel %vm949_vm9, %v3118_v41, %v1071_v19 }
 0x146   : > { %v1076_v24 = vmul.f32 %v1074_v49, %v1074_v49 }
 0x148   : > { %v1077_v26 = vmul.f32 -0.001358992, %v1076_v24  ;;  %v1084_v32 = vmul.f32 -0.00019511016, %v1076_v24 }
 0x14a   : > { %v1078_v45 = vadd.f32 0.041655596, %v1077_v26  ;;  %v1085_v37 = vadd.f32 0.008332121, %v1084_v32 }
 0x14c   : > { %v1079_v16 = vmul.f32 %v1078_v45, %v1076_v24  ;;  %v1086_v33 = vmul.f32 %v1085_v37, %v1076_v24 }
 0x14e   : > { %v1080_v38 = vadd.f32 -0.4999988, %v1079_v16  ;;  %v1087_v31 = vadd.f32 -0.16666654, %v1086_v33 }
 0x150   : > { %v1081_v44 = vmul.f32 %v1080_v38, %v1076_v24  ;;  %v1088_v47 = vmul.f32 %v1087_v31, %v1076_v24 }
 0x152   : > { %v1082_v53 = vadd.f32 1.0, %v1081_v44  ;;  %v1089_v29 = vadd.f32 1.0, %v1088_v47 }
 0x154   : > { %v1090_v46 = vmul.f32 %v1089_v29, %v1074_v49  ;;  %v1098_v6 = vxor.u32 2147483648, %v1082_v53 }
 0x156   : > { %v1095_v63 = vxor.u32 2147483648, %v1090_v46  ;;  %v1099_v21 = vsel %vm1097_vm15, %v1098_v6, %v1090_v46  ;;  %v1723_v3 = vsel %vm1721_vm2, %v1098_v6, %v1090_v46 }
 0x158   : > { %v1096_v60 = vsel %vm1094_vm14, %v1082_v53, %v1095_v63  ;;  %v1720_v1 = vsel %vm1718_vm1, %v1082_v53, %v1095_v63 }
 0x159   : > { %v1100_v36 = vsel %vm1093_vm10, %v1096_v60, %v1099_v21  ;;  %v1724_v11 = vsel %vm1717_vm0, %v1720_v1, %v1723_v3 }
 0x15a   : > { %v1101_v7 = vsel %vm1091_vm3, nan, %v1100_v36  ;;  %v1725_v12 = vsel %vm1091_vm3, nan, %v1724_v11 }
 0x15b   : > { %1105 = vst [vmem:[#allocation2 + $0x10] sm:$0xff] %v1101_v7 }
 0x15c   : > { %1729 = vst [vmem:[#allocation2 + $0x38] sm:$0xff] %v1725_v12 }
 0x15d   : > { %1741 = vst [vmem:[#allocation3 + $0x18] sm:$0xff] %v1101_v7 }
 0x15e   : > { %1745 = vst [vmem:[#allocation3 + $0x38] sm:$0xff] %v1725_v12 }
 0x15f PF: > { %v1748_v34 = vld [vmem:[#allocation2 + $0x18] sm:$0xff]  ;;  %v2954_v15 = vmov 2   ;;  %v2955_v10 = vmov 1   ;;  %v1990_v41 = vld [vmem:[%s4025_s6 + $0x30] sm:$0xff]  ;;  %v3556_v9 = vld [vmem:[%s4025_s6 + $0x20] sm:$0xff]  ;;  %vm1771_vm4 = vcmask 130048  }
 0x160   : > { %v1991_v59 = vld [vmem:[%s4025_s6 + $0x38] sm:$0xff]  ;;  %2807 = vset.pattern.permute.xlu0 %v2954_v15  ;;  %2802 = vset.pattern.permute.xlu2 %v2955_v10  ;;  %v1746_v56 = vld [vmem:[#allocation2 + $0x30] sm:$0xff]  ;;  %v1747_v54 = vld [vmem:[#allocation2] sm:$0xff]  ;;  %v2956_v43 = vmov 0   ;;  %vm2298_vm5 = vcmask 523264   ;;  %s2502_s12 = sshll.u32 %s4028_s9, 4  ;;  %s2503_s12 = int_to_ptr.hbm [resolvable:$true] %s2502_s12 }
 0x161   : > { %2800 = vset.pattern.permute.xlu1 %v2955_v10  ;;  %1916 = vmatpush.msra.mxu2 %v1748_v34  ;;  %v1755_v52 = vld [vmem:[%s4023_s4] sm:$0xff]  ;;  %v1752_v39 = vld [vmem:[#allocation2 + $0x28] sm:$0xff]  ;;  %v1757_v61 = vld [vmem:[%s4023_s4 + $0x10] sm:$0xff]  ;;  %s2957_s19 = smov [#allocation3]   ;;  %s2958_s22 = smov 256   ;;  %vm2482_vm12 = vcmask 1043456  }
 0x162   : > { %v1749_v14 = vld [vmem:[#allocation2 + $0x10] sm:$0xff]  ;;  %2100 = vperm.xlu1 %2800, %v1991_v59   ;;  %2096 = vperm.xlu2 %2802, %v1990_v41   ;;  %v1750_v35 = vld [vmem:[#allocation2 + $0x8] sm:$0xff]  ;;  %v1751_v58 = vld [vmem:[#allocation2 + $0x20] sm:$0xff]  ;;  %s2500_s20 = sshll.u32 %s2957_s19, 4  ;;  %s2959_s30 = smov 16   ;;  %s2501_s20 = int_to_ptr.vmem [resolvable:$true] %s2500_s20 }
 0x163   : > { %1957 = vmatpush.msra.mxu3 %v1749_v14  ;;  %2158 = vperm.xlu0 %2807, %v3556_v9   ;;  %v1753_v17 = vld [vmem:[#allocation2 + $0x38] sm:$0xff]  ;;  %v1763_v50 = vld [vmem:[%s4024_s5] sm:$0xff]  ;;  %v1989_v42 = vld [vmem:[%s4025_s6 + $0x28] sm:$0xff]  ;;  %s2721_s21 = sshll.u32 %s2936_s16, 4  ;;  %s4077_s15 = sand.u32 1, %s2928_s14  }
 0x164   : > { %1917 = vmatpush.msra.mxu2 %v1746_v56  ;;  %1810 = vmatpush.msra.mxu0 %v1752_v39  ;;  %v3577_v25 = vld [vmem:[%s4025_s6] sm:$0xff]  ;;  %v1756_v13 = vld [vmem:[%s4023_s4 + $0x8] sm:$0xff]  ;;  %v1765_v5 = vld [vmem:[%s4024_s5 + $0x10] sm:$0xff]  ;;  %s2518_s11 = scalar_lea.hbm %s4029_s10, %s2721_s21  ;;  %s2488_s28 = scalar_lea.sflag [#allocation6], %s4077_s15 }
 0x165   : > { %1958 = vmatpush.msra.mxu3 %v1747_v54  ;;  %2694 = vmatmul.msk.f32.vlgmr.msra.gmra.mxu2 %vm1771_vm4, %v1755_v52  ;;  %v1764_v62 = vld [vmem:[%s4024_s5 + $0x8] sm:$0xff]  ;;  %v1758_v27 = vld [vmem:[%s4023_s4 + $0x18] sm:$0xff]  ;;  %v1759_v4 = vld [vmem:[%s4023_s4 + $0x20] sm:$0xff] }
 0x166   : > { %2702 = vmatmul.msk.f32.vlgmr.msra.gmra.mxu3 %vm1771_vm4, %v1755_v52  ;;  %1851 = vmatpush.msra.mxu1 %v1753_v17  ;;  %v1766_v20 = vld [vmem:[%s4024_s5 + $0x18] sm:$0xff]  ;;  %v1986_v28 = vld [vmem:[%s4025_s6 + $0x10] sm:$0xff]  ;;  %v1767_v48 = vld [vmem:[%s4024_s5 + $0x20] sm:$0xff] }
 0x167   : > { %1811 = vmatpush.msra.mxu0 %v1750_v35  ;;  %v1987_v0 = vld [vmem:[%s4025_s6 + $0x18] sm:$0xff]  ;;  %v1760_v8 = vld [vmem:[%s4023_s4 + $0x28] sm:$0xff]  ;;  %v2217_v22 = vld [vmem:[%s3089_s17 + $0x30] sm:$0xff] }
 0x168   : > { %1852 = vmatpush.msra.mxu1 %v1751_v58  ;;  %2678 = vmatmul.msk.f32.vlgmr.msra.gmra.mxu0 %vm1771_vm4, %v1763_v50  ;;  %v1985_v23 = vld [vmem:[%s4025_s6 + $0x8] sm:$0xff]  ;;  %v2218_v19 = vld [vmem:[%s3089_s17 + $0x38] sm:$0xff]  ;;  %v1761_v30 = vld [vmem:[%s4023_s4 + $0x30] sm:$0xff] }
 0x169   : > { %2686 = vmatmul.msk.f32.vlgmr.msra.gmra.mxu1 %vm1771_vm4, %v1763_v50  ;;  %v1768_v2 = vld [vmem:[%s4024_s5 + $0x28] sm:$0xff]  ;;  %v1769_v49 = vld [vmem:[%s4024_s5 + $0x30] sm:$0xff]  ;;  %v1762_v26 = vld [vmem:[%s4023_s4 + $0x38] sm:$0xff] }
 0x16a   : > { %2801 = vset.pattern.permute.xlu1 %v2956_v43  ;;  %2803 = vset.pattern.permute.xlu2 %v2954_v15  ;;  %v2216_v24 = vld [vmem:[%s3089_s17 + $0x28] sm:$0xff]  ;;  %v1770_v32 = vld [vmem:[%s4024_s5 + $0x38] sm:$0xff]  ;;  %v2215_v45 = vld [vmem:[%s3089_s17 + $0x20] sm:$0xff] }
 0x16b   : > { %2815 = vset.pattern.permute.xlu0 %v2955_v10  ;;  %2170 = vperm.xlu2 %2803, %v1991_v59   ;;  %v2212_v40 = vld [vmem:[%s3089_s17 + $0x8] sm:$0xff]  ;;  %v2214_v37 = vld [vmem:[%s3089_s17 + $0x18] sm:$0xff]  ;;  %v2213_v57 = vld [vmem:[%s3089_s17 + $0x10] sm:$0xff] }
 0x16c   : > { %2019 = vperm.xlu1 %2801, %v1989_v42   ;;  %2072 = vperm.xlu0 %2815, %v3577_v25   ;;  %v2211_v16 = vld [vmem:[%s3089_s17] sm:$0xff]  ;;  %s2520_s17 = sshll.u32 %s3091_s27, 4  ;;  %s2521_s17 = int_to_ptr.vmem [resolvable:$true] %s2520_s17 }
 0x16d   : > { %2695 = vmatmul.msk.f32.gmra.mxu2 %vm1771_vm4, %v1756_v13  ;;  %v2292_v33 = vld [vmem:[%s4027_s8] sm:$0xff] }
 0x16e   : > { %2703 = vmatmul.msk.f32.gmra.mxu3 %vm1771_vm4, %v1756_v13  ;;  %v1754_v13 = vld [vmem:[%s3084_s25] sm:$0x77]  ;;  %s2522_s25 = sshll.u32 %s2518_s11, 4  ;;  %s2523_s25 = int_to_ptr.hbm [resolvable:$true] %s2522_s25 }
 0x16f   : > { %2723 = dma.vmem_to_hbm [thread:$0]  (%p3051_p2), %s2501_s20, 1024, %s2503_s12, [#allocation4], %s2958_s22, %s2958_s22, %s2959_s30  }
 0x170   : > { %2679 = vmatmul.msk.f32.gmra.mxu0 %vm1771_vm4, %v1764_v62  ;;  %s2876_s12 = sshra.s32 %s2523_s25, 4  ;;  %s2882_s30 = scalar_lea.hbm %s4029_s10, 32  ;;  %s2877_s12 = int_to_ptr.hbm [resolvable:$true] %s2876_s12 }
 0x171   : > { %2687 = vmatmul.msk.f32.gmra.mxu1 %vm1771_vm4, %v1764_v62  ;;  %s2878_s19 = scalar_lea.hbm %s2877_s12, 16  ;;  %p2883_p3 = scmp.lt.s32.totalorder %s2877_s12, %s4029_s10 }
 0x172   : > { %p2879_p13 = scmp.ne.s32.totalorder %s2877_s12, %s2878_s19  ;;  %p2884_p5 = scmp.lt.s32.totalorder %s2882_s30, %s2878_s19 }
 0x173   : > { %2166 = vperm.xlu2 %2803, %v1990_v41  }
 0x174   : > { %2804 = vset.pattern.permute.xlu1 %v2955_v10  ;;  %2816 = vset.pattern.permute.xlu0 %v2956_v43  ;;  %p2880_p0 = pnand %p2879_p13, %p3061_p4  ;;  %p2885_p6 = por %p2884_p5, %p2883_p3 }
 0x175   : > { %2092 = vperm.xlu1 %2804, %v1989_v42   ;;  %2029 = vperm.xlu0 %2816, %v1991_v59  }
 0x176   : > { %2696 = vmatmul.msk.f32.gmra.mxu2 %vm1771_vm4, %v1757_v61  ;;  %2704 = vmatmul.msk.f32.gmra.mxu3 %vm1771_vm4, %v1757_v61  ;;  %p2881_p1 = pneg %p2880_p0 }
 0x178   : > { %2680 = vmatmul.msk.f32.gmra.mxu0 %vm1771_vm4, %v1765_v5  ;;  %p2886_p7 = pnand %p2885_p6, %p2881_p1 }
 0x179   : > { %2688 = vmatmul.msk.f32.gmra.mxu1 %vm1771_vm4, %v1765_v5 }
 0x17b   : > { %2162 = vperm.xlu2 %2803, %v1989_v42  }
 0x17d   : > { %2088 = vperm.xlu1 %2804, %v3556_v9   ;;  %2024 = vperm.xlu0 %2816, %v1990_v41  }
 0x17e   : > { %2697 = vmatmul.msk.f32.gmra.mxu2 %vm1771_vm4, %v1758_v27  ;;  %2705 = vmatmul.msk.f32.gmra.mxu3 %vm1771_vm4, %v1758_v27  ;;  %v2173_v27 = vperm.slane %v1754_v13, 2 }
 0x180   : > { %2681 = vmatmul.msk.f32.gmra.mxu0 %vm1771_vm4, %v1766_v20 }
 0x181   : > { %2689 = vmatmul.msk.f32.gmra.mxu1 %vm1771_vm4, %v1766_v20  ;;  %v2174_v20 = vperm.slane %v1754_v13, 6 }
 0x183   : > { %2806 = vset.pattern.permute.xlu2 %v2955_v10 }
 0x184   : > { %2084 = vperm.xlu2 %2806, %v1987_v0  }
 0x185   : > { %2805 = vset.pattern.permute.xlu1 %v2956_v43  ;;  %2014 = vperm.xlu0 %2816, %v3556_v9  }
 0x186   : > { %2698 = vmatmul.msk.f32.gmra.mxu2 %vm1771_vm4, %v1759_v4  ;;  %2706 = vmatmul.msk.f32.gmra.mxu3 %vm1771_vm4, %v1759_v4  ;;  %v2104_v4 = vperm.slane %v1754_v13, 5 }
 0x187   : > { %2004 = vperm.xlu1 %2805, %v1986_v28  }
 0x188   : > { %2682 = vmatmul.msk.f32.gmra.mxu0 %vm1771_vm4, %v1767_v48 }
 0x189   : > { %2690 = vmatmul.msk.f32.gmra.mxu1 %vm1771_vm4, %v1767_v48  ;;  %v2034_v48 = vperm.slane %v1754_v13, 4 }
 0x18c   : > { %2808 = vset.pattern.permute.xlu2 %v2956_v43 }
 0x18d   : > { %2009 = vperm.xlu0 %2816, %v1987_v0   ;;  %1999 = vperm.xlu2 %2808, %v1985_v23  }
 0x18e   : > { %2699 = vmatmul.msk.f32.gmra.mxu2 %vm1771_vm4, %v1760_v8  ;;  %2707 = vmatmul.msk.f32.gmra.mxu3 %vm1771_vm4, %v1760_v8 }
 0x18f   : > { %2251 = vperm.xlu1 %2805, %v2217_v22  }
 0x190   : > { %2683 = vmatmul.msk.f32.gmra.mxu0 %vm1771_vm4, %v1768_v2 }
 0x191   : > { %2691 = vmatmul.msk.f32.gmra.mxu1 %vm1771_vm4, %v1768_v2  ;;  %v3751_v2 = vperm.slane %v2174_v20, 2 }
 0x195   : > { %2256 = vperm.xlu0 %2816, %v2218_v19   ;;  %2810 = vset.pattern.permute.xlu2 %v2954_v15 }
 0x196   : > { %2700 = vmatmul.msk.f32.gmra.mxu2 %vm1771_vm4, %v1761_v30  ;;  %2708 = vmatmul.msk.f32.gmra.mxu3 %vm1771_vm4, %v1761_v30  ;;  %v3755_v30 = vperm.slane %v2104_v4, 1 }
 0x197   : > { %2809 = vset.pattern.permute.xlu1 %v2955_v10  ;;  %2154 = vperm.xlu2 %2810, %v1987_v0   ;;  %v2103_v0 = vperm.slane %v1754_v13, 1 }
 0x198   : > { %2080 = vperm.xlu1 %2809, %v1986_v28   ;;  %2684 = vmatmul.msk.f32.gmra.mxu0 %vm1771_vm4, %v1769_v49 }
 0x199   : > { %2692 = vmatmul.msk.f32.gmra.mxu1 %vm1771_vm4, %v1769_v49  ;;  %v3753_v19 = vperm.slane %v2103_v0, 1 }
 0x19d   : > { %2246 = vperm.xlu0 %2816, %v2216_v24  }
 0x19e   : > { %2701 = vmatmul.msk.f32.gmra.mxu2 %vm1771_vm4, %v1762_v26  ;;  %2709 = vmatmul.msk.f32.gmra.mxu3 %vm1771_vm4, %v1762_v26  ;;  %v3759_v26 = vperm.slane %v2034_v48, 0 }
 0x19f   : > { %2812 = vset.pattern.permute.xlu2 %v2955_v10 }
 0x1a0   : > { %2811 = vset.pattern.permute.xlu1 %v2956_v43  ;;  %2076 = vperm.xlu2 %2812, %v1985_v23  }
 0x1a1   : > { %1994 = vperm.xlu1 %2811, %v3577_v25   ;;  %2685 = vmatmul.msk.f32.gmra.mxu0 %vm1771_vm4, %v1770_v32 }
 0x1a2   : > { %2693 = vmatmul.msk.f32.gmra.mxu1 %vm1771_vm4, %v1770_v32 }
 0x1a5   : > { %2226 = vperm.xlu0 %2816, %v2212_v40  }
 0x1a8   : > { %2814 = vset.pattern.permute.xlu2 %v2956_v43 }
 0x1a9   : > { %2813 = vset.pattern.permute.xlu1 %v2954_v15  ;;  %2241 = vperm.xlu2 %2814, %v2215_v45  }
 0x1aa   : > { %2150 = vperm.xlu1 %2813, %v1986_v28   ;;  %v2033_v28 = vperm.slane %v1754_v13, 0 }
 0x1ac   : > { %v3757_v24 = vperm.slane %v2033_v28, 0 }
 0x1b1   : > { %2236 = vperm.xlu2 %2814, %v2214_v37  }
 0x1b2   : > { %2146 = vperm.xlu1 %2813, %v1985_v23   ;;  %v3749_v23 = vperm.slane %v2173_v27, 2 }
 0x1b9   : > { %2231 = vperm.xlu2 %2814, %v2213_v57  }
 0x1ba   : > { %2142 = vperm.xlu1 %2813, %v3577_v25  }
 0x1bc   : > { %v2097_v38 = vpop.permute.xlu2 %2096 }
 0x1bd   : > { %v3762_v40 = vmul.f32 %v3753_v19, %v2097_v38  ;;  %v3765_v45 = vmul.f32 %v3755_v30, %v2097_v38 }
 0x1c1   : > { %2295 = vperm.xlu2 %2814, %v2292_v33  }
 0x1c2   : > { %2817 = vset.pattern.permute.xlu1 %v2956_v43 }
 0x1c3   : > { %2221 = vperm.xlu1 %2817, %v2211_v16  }
 0x1c5   : > { %v2171_v51 = vpop.permute.xlu2 %2170 }
 0x1c6   : > { %v3770_v57 = vmul.f32 %v3749_v23, %v2171_v51  ;;  %v3773_v16 = vmul.f32 %v3751_v2, %v2171_v51 }
 0x1c8   : > { %4053 = vst [vmem:[#allocation17_spill] sm:$0xff] %v3770_v57 }
 0x1c9   : > { %4054 = vst [vmem:[#allocation18_spill] sm:$0xff] %v3773_v16 }
 0x1cd   : > { %v2167_v47 = vpop.permute.xlu2 %2166 }
 0x1ce   : > { %v3776_v33 = vmul.f32 %v3749_v23, %v2167_v47 }
 0x1d4   : > { %v3688_v31 = vpop.permute.xlu1 %2100 }
 0x1d5   : > { %v2159_v53 = vpop.permute.xlu0 %2158  ;;  %v2163_v21 = vpop.permute.xlu2 %2162  ;;  %v3795_v51 = vmul.f32 %v3755_v30, %v3688_v31 }
 0x1d6   : > { %v3787_v38 = vmul.f32 %v3751_v2, %v2159_v53  ;;  %v3801_v27 = vmul.f32 %v3751_v2, %v2163_v21 }
 0x1d8   : > { %4056 = vst [vmem:[#allocation20_spill] sm:$0xff] %v3787_v38 }
 0x1d9   : > { %4058 = vst [vmem:[#allocation22_spill] sm:$0xff] %v3801_v27 }
 0x1de   : > { %v3690_v44 = vpop.permute.xlu1 %2019  ;;  %v3698_v1 = vpop.permute.xlu0 %2072 }
 0x1df   : > { %v2085_v34 = vpop.permute.xlu2 %2084  ;;  %v2049_v20 = vmul.f32 %v3757_v24, %v3690_v44  ;;  %v3809_v4 = vmul.f32 %v3753_v19, %v3698_v1 }
 0x1e0   : > { %v2115_v28 = vmul.f32 %v3753_v19, %v2085_v34 }
 0x1e1   : > { %4059 = vst [vmem:[#allocation23_spill] sm:$0xff] %v3809_v4 }
 0x1e5   : > { %v1813_v29 = vpop.f32.mrf.mxu0 }
 0x1e6   : > { %v1854_v18 = vpop.f32.mrf.mxu1 }
 0x1e7   : > { %v3692_v55 = vpop.permute.xlu1 %2092  ;;  %v3710_v14 = vpop.permute.xlu0 %2029 }
 0x1e8   : > { %v1919_v46 = vpop.f32.mrf.mxu2  ;;  %v2000_v52 = vpop.permute.xlu2 %1999 }
 0x1e9   : > { %v3694_v6 = vadd.f32 %v1919_v46, %v1813_v29  ;;  %v1960_v63 = vpop.f32.mrf.mxu3  ;;  %v3779_v29 = vmul.f32 %v3751_v2, %v2167_v47  ;;  %v3784_v46 = vmul.f32 %v3749_v23, %v2159_v53  ;;  %v3798_v47 = vmul.f32 %v3749_v23, %v2163_v21 }
 0x1ea   : > { %v3696_v60 = vadd.f32 %v1960_v63, %v1854_v18  ;;  %v3791_v63 = vmul.f32 %v3753_v19, %v3688_v31  ;;  %v2050_v53 = vmul.f32 %v3759_v26, %v3690_v44  ;;  %v3813_v31 = vmul.f32 %v3755_v30, %v3698_v1 }
 0x1eb   : > { %4049 = vst [vmem:[#allocation13_spill] sm:$0xff] %v3694_v6  ;;  %v2116_v21 = vmul.f32 %v3755_v30, %v2085_v34  ;;  %v3821_v44 = vmul.f32 %v3755_v30, %v3692_v55  ;;  %v2041_v6 = vmul.f32 %v3757_v24, %v2000_v52  ;;  %v2053_v1 = vmul.f32 %v3757_v24, %v3710_v14 }
 0x1ec   : > { %4050 = vst [vmem:[#allocation14_spill] sm:$0xff] %v3696_v60  ;;  %v2119_v60 = vmul.f32 %v3753_v19, %v3692_v55  ;;  %v2042_v34 = vmul.f32 %v3759_v26, %v2000_v52 }
 0x1ed   : > { %v3700_v3 = vpop.f32.mrf.mxu0  ;;  %4055 = vst [vmem:[#allocation19_spill] sm:$0xff] %v3784_v46 }
 0x1ee   : > { %v3702_v36 = vpop.f32.mrf.mxu1  ;;  %4057 = vst [vmem:[#allocation21_spill] sm:$0xff] %v3798_v47 }
 0x1ef   : > { %v3704_v11 = vpop.permute.xlu1 %2088  ;;  %v3726_v39 = vpop.permute.xlu0 %2024  ;;  %4060 = vst [vmem:[#allocation24_spill] sm:$0xff] %v3813_v31  ;;  %v2054_v31 = vmul.f32 %v3759_v26, %v3710_v14 }
 0x1f0   : > { %v3706_v7 = vpop.f32.mrf.mxu2  ;;  %v2117_v55 = vmul.f32 %v3753_v19, %v3704_v11  ;;  %v2118_v38 = vmul.f32 %v3755_v30, %v3704_v11  ;;  %v2052_v16 = vmul.f32 %v3759_v26, %v3726_v39 }
 0x1f1   : > { %v3708_v12 = vpop.f32.mrf.mxu3  ;;  %v3738_v43 = vpop.permute.xlu2 %2154  ;;  %v1923_v4 = vadd.f32 %v3706_v7, %v3700_v3 }
 0x1f3   : > { %v2057_v11 = vadd.f32 %v2041_v6, %v1923_v4  ;;  %v2186_v4 = vmul.f32 %v3751_v2, %v3738_v43 }
 0x1f5   : > { %v3712_v59 = vpop.f32.mrf.mxu0 }
 0x1f6   : > { %v3714_v15 = vpop.f32.mrf.mxu1 }
 0x1f7   : > { %v3747_v5 = vpop.permute.xlu0 %2014 }
 0x1f8   : > { %v2048_v6 = vmul.f32 %v3759_v26, %v3747_v5 }
 0x1f9   : > { %v3716_v10 = vpop.permute.xlu1 %2004  ;;  %v3718_v41 = vpop.f32.mrf.mxu2 }
 0x1fa   : > { %v3720_v9 = vpop.f32.mrf.mxu3  ;;  %v3781_v18 = vpop.permute.xlu2 %2076 }
 0x1fd   : > { %v3722_v56 = vpop.f32.mrf.mxu0 }
 0x1fe   : > { %v3724_v54 = vpop.f32.mrf.mxu1 }
 0x1ff   : > { %v2010_v13 = vpop.permute.xlu0 %2009 }
 0x200   : > { %v2045_v3 = vmul.f32 %v3757_v24, %v2010_v13  ;;  %v2046_v27 = vmul.f32 %v3759_v26, %v2010_v13 }
 0x201   : > { %v3728_v17 = vpop.f32.mrf.mxu2  ;;  %v3730_v35 = vpop.permute.xlu1 %2251 }
 0x202   : > { %4051 = vst [vmem:[#allocation15_spill] sm:$0xff] %v3730_v35  ;;  %v3732_v58 = vpop.f32.mrf.mxu3  ;;  %v1964_v35 = vadd.f32 %v3708_v12, %v3702_v36  ;;  %v1929_v14 = vadd.f32 %v3728_v17, %v3722_v56  ;;  %v2051_v12 = vmul.f32 %v3757_v24, %v3726_v39 }
 0x203   : > { %v1970_v52 = vadd.f32 %v3732_v58, %v3724_v54  ;;  %v2185_v54 = vmul.f32 %v3749_v23, %v3738_v43  ;;  %v2047_v58 = vmul.f32 %v3757_v24, %v3747_v5  ;;  %v3859_v39 = vpop.permute.xlu2 %2241  ;;  %v1967_v5 = vadd.f32 %v3720_v9, %v3714_v15 }
 0x205   : > { %v3734_v50 = vpop.f32.mrf.mxu0 }
 0x206   : > { %v3736_v42 = vpop.f32.mrf.mxu1 }
 0x209   : > { %v3740_v25 = vpop.f32.mrf.mxu2 }
 0x20a   : > { %v3743_v62 = vpop.f32.mrf.mxu3  ;;  %v3745_v61 = vpop.permute.xlu1 %2080  ;;  %v1932_v13 = vadd.f32 %v3740_v25, %v3734_v50  ;;  %v2061_v50 = vadd.f32 %v2045_v3, %v1929_v14  ;;  %v2062_v25 = vadd.f32 %v2046_v27, %v1970_v52 }
 0x20b   : > { %v1973_v56 = vadd.f32 %v3743_v62, %v3736_v42 }
 0x20c   : > { %v2131_v15 = vadd.f32 %v2115_v28, %v2061_v50  ;;  %v2132_v9 = vadd.f32 %v2116_v21, %v2062_v25  ;;  %v4065_v50 = vld [vmem:[#allocation19_spill] sm:$0xff]  ;;  %v4066_v25 = vld [vmem:[#allocation20_spill] sm:$0xff] }
 0x20d   : > { %v1828_v8 = vpop.f32.mrf.mxu0 }
 0x20e   : > { %v1869_v22 = vpop.f32.mrf.mxu1  ;;  %v2201_v21 = vadd.f32 %v2185_v54, %v2131_v15  ;;  %v4064_v54 = vld [vmem:[#allocation22_spill] sm:$0xff] }
 0x211   : > { %v1934_v49 = vpop.f32.mrf.mxu2 }
 0x212   : > { %v1975_v32 = vpop.f32.mrf.mxu3  ;;  %v1935_v47 = vadd.f32 %v1934_v49, %v1828_v8  ;;  %v2257_v49 = vpop.permute.xlu0 %2256 }
 0x213   : > { %v3767_v37 = vpop.permute.xlu1 %1994  ;;  %v1976_v17 = vadd.f32 %v1975_v32, %v1869_v22  ;;  %v2044_v22 = vmul.f32 %v3759_v26, %v3716_v10  ;;  %v1926_v32 = vadd.f32 %v3718_v41, %v3712_v59 }
 0x214   : > { %4052 = vst [vmem:[#allocation16_spill] sm:$0xff] %v3767_v37 }
 0x215   : > { %v1831_v0 = vpop.f32.mrf.mxu0  ;;  %v2066_v27 = vadd.f32 %v2050_v53, %v1976_v17  ;;  %v2060_v14 = vadd.f32 %v2044_v22, %v1967_v5 }
 0x216   : > { %v1872_v48 = vpop.f32.mrf.mxu1 }
 0x219   : > { %v1937_v37 = vpop.f32.mrf.mxu2 }
 0x21a   : > { %v1938_v7 = vadd.f32 %v1937_v37, %v1831_v0  ;;  %v1978_v46 = vpop.f32.mrf.mxu3  ;;  %v2058_v37 = vadd.f32 %v2042_v34, %v1964_v35  ;;  %v2043_v35 = vmul.f32 %v3757_v24, %v3716_v10  ;;  %v2064_v34 = vadd.f32 %v2048_v6, %v1973_v56 }
 0x21b   : > { %v1979_v36 = vadd.f32 %v1978_v46, %v1872_v48  ;;  %v2065_v46 = vadd.f32 %v2049_v20, %v1935_v47  ;;  %v2063_v48 = vadd.f32 %v2047_v58, %v1932_v13  ;;  %v2112_v10 = vmul.f32 %v3755_v30, %v3781_v18 }
 0x21c   : > { %v3847_v57 = vpop.permute.xlu1 %2150  ;;  %v2067_v8 = vadd.f32 %v2051_v12, %v1938_v7  ;;  %v2059_v43 = vadd.f32 %v2043_v35, %v1926_v32  ;;  %v2134_v13 = vadd.f32 %v2118_v38, %v2064_v34  ;;  %v2136_v56 = vadd.f32 %v3821_v44, %v2066_v27  ;;  %v4061_v44 = vld [vmem:[#allocation17_spill] sm:$0xff] }
 0x21d   : > { %v2068_v42 = vadd.f32 %v2052_v16, %v1979_v36  ;;  %v2111_v16 = vmul.f32 %v3753_v19, %v3781_v18  ;;  %v2135_v52 = vadd.f32 %v2119_v60, %v2065_v46  ;;  %v2133_v12 = vadd.f32 %v2117_v55, %v2063_v48 }
 0x21e   : > { %v1834_v62 = vpop.f32.mrf.mxu0  ;;  %v2137_v59 = vadd.f32 %v3762_v40, %v2067_v8  ;;  %v2128_v58 = vadd.f32 %v2112_v10, %v2058_v37  ;;  %v2202_v6 = vadd.f32 %v2186_v4, %v2132_v9  ;;  %v2113_v60 = vmul.f32 %v3753_v19, %v3745_v61  ;;  %v4063_v37 = vld [vmem:[#allocation18_spill] sm:$0xff] }
 0x21f   : > { %v1875_v0 = vpop.f32.mrf.mxu1  ;;  %v2138_v47 = vadd.f32 %v3765_v45, %v2068_v42  ;;  %v2127_v18 = vadd.f32 %v2111_v16, %v2057_v11  ;;  %v2114_v38 = vmul.f32 %v3755_v30, %v3745_v61  ;;  %v2237_v11 = vpop.permute.xlu2 %2236  ;;  %v2206_v35 = vadd.f32 %v4064_v54, %v2136_v56  ;;  %v4067_v42 = vld [vmem:[#allocation16_spill] sm:$0xff] }
 0x220   : > { %v2207_v28 = vadd.f32 %v3776_v33, %v2137_v59  ;;  %v2039_v19 = vmul.f32 %v3757_v24, %v4067_v42  ;;  %v2183_v61 = vmul.f32 %v3749_v23, %v3847_v57  ;;  %v2040_v32 = vmul.f32 %v3759_v26, %v4067_v42 }
 0x221   : > { %v1940_v3 = vpop.f32.mrf.mxu2  ;;  %v2208_v8 = vadd.f32 %v3779_v29, %v2138_v47  ;;  %v2204_v29 = vadd.f32 %v4066_v25, %v2134_v13  ;;  %v2184_v5 = vmul.f32 %v3751_v2, %v3847_v57  ;;  %v2129_v4 = vadd.f32 %v2113_v60, %v2059_v43 }
 0x222   : > { %v1941_v41 = vadd.f32 %v1940_v3, %v1834_v62  ;;  %v1981_v7 = vpop.f32.mrf.mxu3  ;;  %v4068_v62 = vld [vmem:[#allocation15_spill] sm:$0xff]  ;;  %v2130_v3 = vadd.f32 %v2114_v38, %v2060_v14 }
 0x223   : > { %v1982_v20 = vadd.f32 %v1981_v7, %v1875_v0  ;;  %v2271_v22 = vadd.f32 %v4068_v62, %v2207_v28  ;;  %v2272_v0 = vadd.f32 %v4068_v62, %v2208_v8  ;;  %v2199_v26 = vadd.f32 %v2183_v61, %v2129_v4  ;;  %v4071_v8 = vld [vmem:[#allocation23_spill] sm:$0xff] }
 0x224   : > { %v2069_v53 = vadd.f32 %v2053_v1, %v1941_v41  ;;  %v2147_v36 = vpop.permute.xlu1 %2146  ;;  %v4062_v1 = vld [vmem:[#allocation21_spill] sm:$0xff]  ;;  %v2200_v47 = vadd.f32 %v2184_v5, %v2130_v3  ;;  %v2268_v43 = vadd.f32 %v3859_v39, %v2204_v29 }
 0x225   : > { %v2070_v17 = vadd.f32 %v2054_v31, %v1982_v20  ;;  %v2205_v55 = vadd.f32 %v4062_v1, %v2135_v52  ;;  %v2181_v48 = vmul.f32 %v3749_v23, %v2147_v36  ;;  %v2182_v16 = vmul.f32 %v3751_v2, %v2147_v36  ;;  %v4069_v41 = vld [vmem:[#allocation13_spill] sm:$0xff] }
 0x226   : > { %v2139_v40 = vadd.f32 %v3791_v63, %v2069_v53  ;;  %v2247_v63 = vpop.permute.xlu0 %2246  ;;  %v2055_v7 = vadd.f32 %v2039_v19, %v4069_v41  ;;  %v2287_v15 = vmax.f32 %v2271_v22, 0.0  ;;  %v2288_v20 = vmax.f32 %v2272_v0, 0.0 }
 0x227   : > { %v2140_v45 = vadd.f32 %v3795_v51, %v2070_v17  ;;  %v2203_v51 = vadd.f32 %v4065_v50, %v2133_v12  ;;  %v2269_v27 = vadd.f32 %v2247_v63, %v2205_v55  ;;  %v2270_v59 = vadd.f32 %v2247_v63, %v2206_v35  ;;  %v2232_v13 = vpop.permute.xlu2 %2231 }
 0x228   : > { %v2209_v31 = vadd.f32 %v4061_v44, %v2139_v40  ;;  %v2265_v52 = vadd.f32 %v2237_v11, %v2201_v21  ;;  %v2197_v14 = vadd.f32 %v2181_v48, %v2127_v18  ;;  %v2266_v12 = vadd.f32 %v2237_v11, %v2202_v6  ;;  %v4072_v21 = vld [vmem:[#allocation24_spill] sm:$0xff] }
 0x229   : > { %v2210_v33 = vadd.f32 %v4063_v37, %v2140_v45  ;;  %v2267_v57 = vadd.f32 %v3859_v39, %v2203_v51  ;;  %v2285_v36 = vmax.f32 %v2269_v27, 0.0  ;;  %v2198_v56 = vadd.f32 %v2182_v16, %v2128_v58  ;;  %v2291_v51 = vld [vmem:[%s4026_s7] sm:$0xff] }
 0x22a   : > { %v2273_v30 = vadd.f32 %v2257_v49, %v2209_v31  ;;  %v2286_v40 = vmax.f32 %v2270_v59, 0.0  ;;  %v2263_v28 = vadd.f32 %v2232_v13, %v2199_v26  ;;  %v2125_v60 = vadd.f32 %v4071_v8, %v2055_v7 }
 0x22b   : > { %v2274_v46 = vadd.f32 %v2257_v49, %v2210_v33  ;;  %v4070_v49 = vld [vmem:[#allocation14_spill] sm:$0xff]  ;;  %v2283_v45 = vmax.f32 %v2267_v57, 0.0  ;;  %v2264_v39 = vadd.f32 %v2232_v13, %v2200_v47  ;;  %v2284_v18 = vmax.f32 %v2268_v43, 0.0 }
 0x22c   : > { %v2143_v34 = vpop.permute.xlu1 %2142  ;;  %v2289_v24 = vmax.f32 %v2273_v30, 0.0  ;;  %v2056_v9 = vadd.f32 %v2040_v32, %v4070_v49  ;;  %v2281_v6 = vmax.f32 %v2265_v52, 0.0  ;;  %v2282_v1 = vmax.f32 %v2266_v12, 0.0 }
 0x22d   : > { %v2290_v10 = vmax.f32 %v2274_v46, 0.0  ;;  %v2179_v53 = vmul.f32 %v3749_v23, %v2143_v34  ;;  %v2180_v17 = vmul.f32 %v3751_v2, %v2143_v34  ;;  %v2279_v63 = vmax.f32 %v2263_v28, 0.0 }
 0x22e   : > { %2310 = vmatpush.msrb.mxu0 %v2289_v24  ;;  %v2227_v38 = vpop.permute.xlu0 %2226  ;;  %v2126_v23 = vadd.f32 %v4072_v21, %v2056_v9  ;;  %v2280_v33 = vmax.f32 %v2264_v39, 0.0 }
 0x22f   : > { %2330 = vmatpush.msrb.mxu1 %v2290_v10  ;;  %v2195_v44 = vadd.f32 %v2179_v53, %v2125_v60  ;;  %v2261_v31 = vadd.f32 %v2227_v38, %v2197_v14  ;;  %v2262_v55 = vadd.f32 %v2227_v38, %v2198_v56  ;;  %v2296_v29 = vpop.permute.xlu2 %2295 }
 0x230   : > { %2311 = vmatpush.msrb.mxu0 %v2287_v15  ;;  %v2196_v2 = vadd.f32 %v2180_v17, %v2126_v23 }
 0x231   : > { %2331 = vmatpush.msrb.mxu1 %v2288_v20  ;;  %v2277_v54 = vmax.f32 %v2261_v31, 0.0  ;;  %v2278_v35 = vmax.f32 %v2262_v55, 0.0 }
 0x232   : > { %2312 = vmatpush.msrb.mxu0 %v2285_v36 }
 0x233   : > { %2332 = vmatpush.msrb.mxu1 %v2286_v40 }
 0x234   : > { %2313 = vmatpush.msrb.mxu0 %v2283_v45 }
 0x235   : > { %2333 = vmatpush.msrb.mxu1 %v2284_v18  ;;  %v2222_v58 = vpop.permute.xlu1 %2221 }
 0x236   : > { %v2259_v11 = vadd.f32 %v2222_v58, %v2195_v44  ;;  %2314 = vmatpush.msrb.mxu0 %v2281_v6  ;;  %v2260_v37 = vadd.f32 %v2222_v58, %v2196_v2 }
 0x237   : > { %2334 = vmatpush.msrb.mxu1 %v2282_v1 }
 0x238   : > { %2315 = vmatpush.msrb.mxu0 %v2279_v63  ;;  %v2275_v50 = vmax.f32 %v2259_v11, 0.0  ;;  %v2276_v25 = vmax.f32 %v2260_v37, 0.0 }
 0x239   : > { %2335 = vmatpush.msrb.mxu1 %v2280_v33 }
 0x23a   : > { %2316 = vmatpush.msrb.mxu0 %v2277_v54 }
 0x23b   : > { %2336 = vmatpush.msrb.mxu1 %v2278_v35 }
 0x23c   : > { %2317 = vmatpush.msrb.mxu0 %v2275_v50 }
 0x23d   : > { %2337 = vmatpush.msrb.mxu1 %v2276_v25  ;;  %2710 = vmatmul.msk.f32.vlgmr.msrb.gmra.mxu0 %vm2298_vm5, %v2291_v51 }
 0x23e   : > { %2711 = vmatmul.msk.f32.vlgmr.msrb.gmra.mxu1 %vm2298_vm5, %v2291_v51 }
 0x2ba   : > { %v2319_v42 = vpop.f32.mrf.mxu0 }
 0x2bb   : > { %v2320_v19 = vadd.f32 %v2319_v42, %v2296_v29  ;;  %v2339_v61 = vpop.f32.mrf.mxu1 }
 0x2bc   : > { %v2340_v30 = vadd.f32 %v2339_v61, %v2296_v29 }
 0x2bd   : > { %v2344_v62 = vrot.slane %v2320_v19, 1  ;;  %v2350_v5 = vrot.slane %v2320_v19, 2  ;;  %v2356_v48 = vrot.slane %v2320_v19, 3 }
 0x2be   : > { %v2345_v22 = vrot.slane %v2340_v30, 1  ;;  %v2351_v0 = vrot.slane %v2340_v30, 2  ;;  %v2357_v24 = vrot.slane %v2340_v30, 3 }
 0x2bf   : > { %v2348_v32 = vmax.f32 %v2320_v19, %v2344_v62 }
 0x2c0   : > { %v2349_v46 = vmax.f32 %v2340_v30, %v2345_v22 }
 0x2c1   : > { %v2354_v4 = vmax.f32 %v2348_v32, %v2350_v5 }
 0x2c2   : > { %v2355_v34 = vmax.f32 %v2349_v46, %v2351_v0 }
 0x2c3   : > { %v2360_v27 = vmax.f32 %v2354_v4, %v2356_v48 }
 0x2c4   : > { %v2361_v3 = vmax.f32 %v2355_v34, %v2357_v24 }
 0x2c5   : > { %v2362_v16 = vperm.slane %v2360_v27, 0  ;;  %v2422_v10 = vperm.slane %v2360_v27, 4 }
 0x2c6   : > { %v2363_v59 = vperm.slane %v2361_v3, 0  ;;  %v2423_v41 = vperm.slane %v2361_v3, 4 }
 0x2c7   : > { %v2364_v7 = vsub.f32 %v2320_v19, %v2362_v16  ;;  %v2424_v26 = vsub.f32 %v2320_v19, %v2422_v10 }
 0x2c8   : > { %v2365_v15 = vsub.f32 %v2340_v30, %v2363_v59  ;;  %v2425_v57 = vsub.f32 %v2340_v30, %v2423_v41 }
 0x2c9   : > { %v2366_v49 = vmul.f32 1.442695, %v2364_v7  ;;  %v2426_v9 = vmul.f32 1.442695, %v2424_v26 }
 0x2ca   : > { %v2368_v47 = vmul.f32 1.442695, %v2365_v15  ;;  %v2428_v20 = vmul.f32 1.442695, %v2425_v57 }
 0x2cb   : > { %2818 = vpow2.f32 %v2366_v49 }
 0x2cc   : > { %2820 = vpow2.f32 %v2426_v9 }
 0x2cd   : > { %2822 = vpow2.f32 %v2368_v47 }
 0x2ce   : > { %2824 = vpow2.f32 %v2428_v20 }
 0x2d1   : > { %v3920_v43 = vpop.eup %2818 }
 0x2d2   : > { %v3922_v52 = vpop.eup %2820  ;;  %v2372_v14 = vrot.slane %v3920_v43, 1  ;;  %v2378_v17 = vrot.slane %v3920_v43, 2  ;;  %v2384_v39 = vrot.slane %v3920_v43, 3 }
 0x2d3   : > { %v3925_v53 = vpop.eup %2822  ;;  %v2432_v36 = vrot.slane %v3922_v52, 1  ;;  %v2438_v45 = vrot.slane %v3922_v52, 2  ;;  %v2444_v44 = vrot.slane %v3922_v52, 3 }
 0x2d4   : > { %v3928_v12 = vpop.eup %2824  ;;  %v2373_v13 = vrot.slane %v3925_v53, 1  ;;  %v2376_v56 = vadd.f32 %v3920_v43, %v2372_v14  ;;  %v2379_v60 = vrot.slane %v3925_v53, 2  ;;  %v2385_v31 = vrot.slane %v3925_v53, 3 }
 0x2d5   : > { %v2433_v40 = vrot.slane %v3928_v12, 1  ;;  %v2436_v28 = vadd.f32 %v3922_v52, %v2432_v36  ;;  %v2439_v21 = vrot.slane %v3928_v12, 2  ;;  %v2445_v1 = vrot.slane %v3928_v12, 3 }
 0x2d6   : > { %v2377_v8 = vadd.f32 %v3925_v53, %v2373_v13  ;;  %v2382_v38 = vadd.f32 %v2378_v17, %v2376_v56 }
 0x2d7   : > { %v2437_v18 = vadd.f32 %v3928_v12, %v2433_v40  ;;  %v2442_v23 = vadd.f32 %v2438_v45, %v2436_v28 }
 0x2d8   : > { %v2383_v6 = vadd.f32 %v2379_v60, %v2377_v8  ;;  %v2388_v58 = vadd.f32 %v2384_v39, %v2382_v38 }
 0x2d9   : > { %v2443_v2 = vadd.f32 %v2439_v21, %v2437_v18  ;;  %v2448_v55 = vadd.f32 %v2444_v44, %v2442_v23 }
 0x2da   : > { %v2389_v11 = vadd.f32 %v2385_v31, %v2383_v6  ;;  %v2390_v63 = vperm.slane %v2388_v58, 0 }
 0x2db   : > { %v2449_v37 = vadd.f32 %v2445_v1, %v2443_v2  ;;  %v2450_v33 = vperm.slane %v2448_v55, 4 }
 0x2dc   : > { %v2391_v54 = vperm.slane %v2389_v11, 0  ;;  %2826 = vrcp.f32 %v2390_v63  ;;  %v2401_v50 = vand.u32 2147483647, %v2390_v63  ;;  %v2403_v51 = vand.u32 2147483648, %v2390_v63 }
 0x2dd   : > { %v3944_v35 = vperm.slane %v2449_v37, 4  ;;  %2828 = vrcp.f32 %v2450_v33  ;;  %vm2397_vm6 = vweird.f32 %v2390_v63  ;;  %vm2457_vm8 = vweird.f32 %v2450_v33 }
 0x2de   : > { %2830 = vrcp.f32 %v2391_v54  ;;  %vm3947_vm7 = vcmp.eq.f32.partialorder %v2401_v50, 8.507059e+37  ;;  %v2416_v30 = vand.u32 2147483647, %v2391_v54  ;;  %v2404_v32 = vor.u32 1.1754944e-38, %v2403_v51 }
 0x2df   : > { %2832 = vrcp.f32 %v3944_v35  ;;  %vm2412_vm11 = vweird.f32 %v2391_v54  ;;  %v2418_v0 = vand.u32 2147483648, %v2391_v54  ;;  %v2461_v48 = vand.u32 2147483647, %v2450_v33 }
 0x2e0   : > { %v2463_v34 = vand.u32 2147483648, %v2450_v33  ;;  %vm3952_vm9 = vcmp.eq.f32.partialorder %v2416_v30, 8.507059e+37  ;;  %vm2472_vm14 = vweird.f32 %v3944_v35  ;;  %v2476_v57 = vand.u32 2147483647, %v3944_v35 }
 0x2e1   : > { %v2478_v49 = vand.u32 2147483648, %v3944_v35  ;;  %v2419_v36 = vor.u32 1.1754944e-38, %v2418_v0  ;;  %vm2462_vm4 = vcmp.eq.f32.partialorder %v2461_v48, 8.507059e+37 }
 0x2e2   : > { %v2827_v25 = vpop.eup %2826  ;;  %v2464_v15 = vor.u32 1.1754944e-38, %v2463_v34 }
 0x2e3   : > { %v2829_v29 = vpop.eup %2828  ;;  %v2393_v42 = vmul.f32 %v2827_v25, %v2390_v63  ;;  %vm2398_vm13 = vweird.f32 %v2827_v25  ;;  %v2479_v60 = vor.u32 1.1754944e-38, %v2478_v49 }
 0x2e4   : > { %v2831_v19 = vpop.eup %2830  ;;  %v2453_v62 = vmul.f32 %v2829_v29, %v2450_v33  ;;  %vm2458_vm10 = vweird.f32 %v2829_v29  ;;  %vm2399_vm0 = vmor %vm2397_vm6, %vm2398_vm13  ;;  %vm2477_vm6 = vcmp.eq.f32.partialorder %v2476_v57, 8.507059e+37 }
 0x2e5   : > { %v2394_v22 = vsub.f32 1.0, %v2393_v42  ;;  %v2408_v5 = vmul.f32 %v2831_v19, %v2391_v54  ;;  %v2833_v46 = vpop.eup %2832  ;;  %vm2413_vm15 = vweird.f32 %v2831_v19  ;;  %vm2459_vm1 = vmor %vm2457_vm8, %vm2458_vm10 }
 0x2e6   : > { %v2454_v4 = vsub.f32 1.0, %v2453_v62  ;;  %v2468_v3 = vmul.f32 %v2833_v46, %v3944_v35  ;;  %vm2473_vm2 = vweird.f32 %v2833_v46  ;;  %vm2414_vm3 = vmor %vm2412_vm11, %vm2413_vm15 }
 0x2e7   : > { %v2395_v24 = vmul.f32 %v2827_v25, %v2394_v22  ;;  %v2409_v27 = vsub.f32 1.0, %v2408_v5  ;;  %vm2474_vm5 = vmor %vm2472_vm14, %vm2473_vm2 }
 0x2e8   : > { %v2455_v10 = vmul.f32 %v2829_v29, %v2454_v4  ;;  %v2469_v7 = vsub.f32 1.0, %v2468_v3 }
 0x2e9   : > { %v2396_v59 = vadd.f32 %v2827_v25, %v2395_v24  ;;  %v2410_v41 = vmul.f32 %v2831_v19, %v2409_v27 }
 0x2ea   : > { %v2456_v26 = vadd.f32 %v2829_v29, %v2455_v10  ;;  %v2470_v20 = vmul.f32 %v2833_v46, %v2469_v7 }
 0x2eb   : > { %v2400_v9 = vsel %vm2399_vm0, %v2827_v25, %v2396_v59  ;;  %v2411_v47 = vadd.f32 %v2831_v19, %v2410_v41 }
 0x2ec   : > { %v2405_v14 = vsel %vm3947_vm7, %v2404_v32, %v2400_v9  ;;  %v2460_v13 = vsel %vm2459_vm1, %v2829_v29, %v2456_v26  ;;  %v2471_v28 = vadd.f32 %v2833_v46, %v2470_v20 }
 0x2ed   : > { %v2406_v56 = vmul.f32 %v3920_v43, %v2405_v14  ;;  %v2415_v17 = vsel %vm2414_vm3, %v2831_v19, %v2411_v47  ;;  %v2465_v40 = vsel %vm2462_vm4, %v2464_v15, %v2460_v13 }
 0x2ee   : > { %v2420_v45 = vsel %vm3952_vm9, %v2419_v36, %v2415_v17  ;;  %v2466_v8 = vmul.f32 %v3922_v52, %v2465_v40  ;;  %v2475_v39 = vsel %vm2474_vm5, %v2833_v46, %v2471_v28 }
 0x2ef   : > { %v2421_v38 = vmul.f32 %v3925_v53, %v2420_v45  ;;  %v2480_v43 = vsel %vm2477_vm6, %v2479_v60, %v2475_v39 }
 0x2f0   : > { %v2483_v18 = vsel %vm2482_vm12, %v2406_v56, %v2466_v8  ;;  %v2481_v21 = vmul.f32 %v3928_v12, %v2480_v43 }
 0x2f1   : > { %2485 = vst [vmem:[%s3091_s27] sm:$0xff] %v2483_v18 }
 0x2f2   : > { %v2484_v52 = vsel %vm2482_vm12, %v2421_v38, %v2481_v21 }
 0x2f3   : > { %2486 = vst [vmem:[%s3091_s27 + $0x8] sm:$0xff] %v2484_v52 }
 0x2f4   : > { %2889 = shalt.err (!%p2886_p7)
}
 0x2f5   : > { %2724 = dma.vmem_to_hbm [thread:$0]  (%p3061_p4), %s2521_s17, 256, %s2523_s25, %s2488_s28  }
 0x2f6   : > { %2915 = dma.done.wait (%p3051_p2), [#allocation4], 1024  }
 0x2f7   : > { %2917 = vsyncadd (%p3051_p2), [#allocation4], 4294966272 }
 0x2f8 PF: > { %p2734_p9 = scmp.ge.s32.totalorder %s2944_s18, 2  ;;  %s2539_s27 = sand.u32 1, %s2924_s13  }
 0x2f9   : > { %s2540_s29 = scalar_lea.sflag [#allocation6], %s2539_s27 }
 0x2fa   : > { %p2729_p10 = pnand %p2734_p9, %p3068_p8 }
 0x2fc   : > { %p2730_p11 = pneg %p2729_p10 }
 0x2fe   : > { %2919 = dma.done.wait (%p2730_p11), %s2540_s29, 256  }
 0x2ff   : > { %2921 = vsyncadd (%p2730_p11), %s2540_s29, 4294967040  ;;  %s25_s18 = sadd.s32 1, %s2944_s18   ;;  %s4078_s24 = sld [smem:[#allocation9_spill]] }
 0x300   : > { %p22_p4 = scmp.ge.s32.totalorder %s25_s18, 4   ;;  %s4079_s15 = sld [smem:[#allocation12_spill]] }
 0x301   : > { %s4080_s16 = sld [smem:[#allocation10_spill]]  ;;  %s4082_s13 = smov %s2928_s14 }
 0x302   : > { %s4081_s17 = sld [smem:[#allocation11_spill]]  ;;  %24 = sbr.rel (!%p22_p4) target bundleno = 5 (0x5), region = 111 }
 0x305   : > { %s4083_s14 = smov %s4078_s24 }
 0x307   :  { %2546 = vsyncpa [#allocation4], 1 }
 0x308   :  { %2548 = vsyncpa [#allocation4 + $0x1], 1 }
 0x309   :  { %2549 = vsyncpa [#allocation6], 1 }
 0x30a   :  { %2551 = vsyncpa [#allocation6 + $0x1], 1 }

</bundles_post_ra>
